<compile_context>
chip_gen: v7x
topology: tpu7x:2x2x1
jax: 0.10.0
libtpu: 0.0.40
codegen_flags: <defaults>
</compile_context>

<pallas_src>
import math

import jax
import jax.numpy as jnp
from jax.experimental import pallas as pl
from jax.experimental.pallas import tpu as pltpu

INPUT_SIZE = 64
HIDDEN_SIZE = 64
OUTPUT_SIZE = 1
NUM_LAYERS = 2  # hard-coded as two explicit LSTM layers below


# ----------------------------------------------------------------------------- kernel
def rnn_forward(x, kp):
    """x: [B, T, D] float32 (batch_first, like the PyTorch module)."""
    B, T, D = x.shape
    assert D == INPUT_SIZE
    H = HIDDEN_SIZE
    G = 4 * H
    H3 = 3 * H

    # Time-major + flatten in the XLA wrapper (tiny, free) so per-timestep reads in the
    # kernel are contiguous static sublane slices.  Row r = t*B + b.
    x_tm = jnp.transpose(x.astype(jnp.float32), (1, 0, 2)).reshape(T * B, D)

    def kernel(x_ref, wih1_ref, whh1_ref, b1_ref,
               w2in_ref, w2rec_ref, b2_ref, wfc_ref, bfc_ref, out_ref):
        # ---- Off-critical-path: layer-0 input projection for ALL timesteps (bias folded).
        xp1 = (jnp.dot(x_ref[...], wih1_ref[...], preferred_element_type=jnp.float32)
               + b1_ref[...])                                           # [T*B, 4H]

        # Hoisted weight loads (reused across all timesteps).
        w_hh1 = whh1_ref[...]                                           # [H, 4H]
        w2_rec = w2rec_ref[...]                                         # [H, 4H]

        def lstm_act(gates, c):
            # Fused gate order (i, f, o, g): one EUP sigmoid over 3H lanes + one tanh over H.
            s = jax.nn.sigmoid(gates[:, :H3])
            g = jnp.tanh(gates[:, H3:])
            c_new = s[:, H:2 * H] * c + s[:, :H] * g
            h_new = s[:, 2 * H:H3] * jnp.tanh(c_new)
            return h_new, c_new

        zeros = jnp.zeros((B, H), jnp.float32)  # h_0 / c_0 are zeros, as in the PyTorch forward

        # ---- Layer-0 recurrence (serial): one [B,H]x[H,4H] MXU op + fused activations / step.
        h1, c1 = zeros, zeros
        h1_seq = []
        for t in range(T):  # fully unrolled; static indices
            g1 = xp1[t * B:(t + 1) * B, :] + jnp.dot(
                h1, w_hh1, preferred_element_type=jnp.float32)
            h1, c1 = lstm_act(g1, c1)
            h1_seq.append(h1)

        # ---- Layer-1 input projection hoisted off the serial path: ONE [T*B,H]x[H,4H] matmul.
        h1_all = jnp.concatenate(h1_seq, axis=0)                        # [T*B, H]
        xp2 = (jnp.dot(h1_all, w2in_ref[...], preferred_element_type=jnp.float32)
               + b2_ref[...])                                           # [T*B, 4H]

        # ---- Layer-1 recurrence: only the recurrent dot is serial (no concat, no input matmul).
        h2, c2 = zeros, zeros
        for t in range(T):
            g2 = xp2[t * B:(t + 1) * B, :] + jnp.dot(
                h2, w2_rec, preferred_element_type=jnp.float32)
            h2, c2 = lstm_act(g2, c2)

        # ---- fc on the last timestep's top-layer state: VPU multiply + lane reduce
        #      (avoids an N=1 MXU op + 1-lane masked result pop).
        out_ref[...] = (jnp.sum(h2 * wfc_ref[...], axis=-1, keepdims=True)
                        + bfc_ref[...])

    vmem = pl.BlockSpec(memory_space=pltpu.MemorySpace.VMEM)
    return pl.pallas_call(
        kernel,
        out_shape=jax.ShapeDtypeStruct((B, OUTPUT_SIZE), jnp.float32),
        in_specs=[vmem] * 9,
        out_specs=vmem,
    )(x_tm,
      kp["wih1"], kp["whh1"], kp["b1"],
      kp["w2_in"], kp["w2_rec"], kp["b2"],
      kp["wfc_row"], kp["bfc"])


# ----------------------------------------------------------------------------- params
def init_torch_params(key):
    """PyTorch-native layout/init: nn.LSTM + nn.Linear, U(-1/sqrt(H), 1/sqrt(H))."""
    D, H, O = INPUT_SIZE, HIDDEN_SIZE, OUTPUT_SIZE
    k = 1.0 / math.sqrt(H)
    keys = jax.random.split(key, 10)

    def u(kk, shape):
        return jax.random.uniform(kk, shape, jnp.float32, -k, k)

    return {
        "weight_ih_l0": u(keys[0], (4 * H, D)),
        "weight_hh_l0": u(keys[1], (4 * H, H)),
        "bias_ih_l0":   u(keys[2], (4 * H,)),
        "bias_hh_l0":   u(keys[3], (4 * H,)),
        "weight_ih_l1": u(keys[4], (4 * H, H)),
        "weight_hh_l1": u(keys[5], (4 * H, H)),
        "bias_ih_l1":   u(keys[6], (4 * H,)),
        "bias_hh_l1":   u(keys[7], (4 * H,)),
        "fc_weight":    u(keys[8], (O, H)),
        "fc_bias":      u(keys[9], (O,)),
    }


def pack_params(tp):
    """Convert PyTorch-layout params to the kernel's fused layout.

    PyTorch fuses gates along dim 0 in order (i, f, g, o); the kernel uses (i, f, o, g) so
    the three sigmoid gates are lane-contiguous.  Weights are transposed for
    right-multiplication, b_ih + b_hh are pre-summed, layer-1 weights stay split
    (input vs recurrent) so the loop body needs no concat.
    """
    H = HIDDEN_SIZE
    perm = jnp.concatenate([jnp.arange(0, 2 * H),        # i, f
                            jnp.arange(3 * H, 4 * H),    # o
                            jnp.arange(2 * H, 3 * H)])   # g

    def fuse(w_ih, w_hh, b_ih, b_hh):
        return (w_ih.T[:, perm], w_hh.T[:, perm],
                (b_ih + b_hh)[perm].reshape(1, -1))

    wih1, whh1, b1 = fuse(tp["weight_ih_l0"], tp["weight_hh_l0"],
                          tp["bias_ih_l0"], tp["bias_hh_l0"])
    w2_in, w2_rec, b2 = fuse(tp["weight_ih_l1"], tp["weight_hh_l1"],
                             tp["bias_ih_l1"], tp["bias_hh_l1"])
    return {
        "wih1": wih1, "whh1": whh1, "b1": b1,
        "w2_in": w2_in, "w2_rec": w2_rec, "b2": b2,
        "wfc_row": tp["fc_weight"].reshape(1, H),          # [1, H] row for the VPU tail
        "bfc": tp["fc_bias"].reshape(1, OUTPUT_SIZE),
    }


# ----------------------------------------------------------------------------- reference
def rnn_reference(x, tp):
    """Pure-JAX replica of the PyTorch forward (nn.LSTM gate order i, f, g, o)."""
    B, T, _ = x.shape
    H = HIDDEN_SIZE

    def cell(x_t, h, c, w_ih, w_hh, b_ih, b_hh):
        g = x_t @ w_ih.T + h @ w_hh.T + b_ih + b_hh
        i = jax.nn.sigmoid(g[:, 0:H])
        f = jax.nn.sigmoid(g[:, H:2 * H])
        gg = jnp.tanh(g[:, 2 * H:3 * H])
        o = jax.nn.sigmoid(g[:, 3 * H:4 * H])
        c = f * c + i * gg
        h = o * jnp.tanh(c)
        return h, c

    h1 = c1 = h2 = c2 = jnp.zeros((B, H), jnp.float32)
    for t in range(T):
        h1, c1 = cell(x[:, t, :], h1, c1, tp["weight_ih_l0"], tp["weight_hh_l0"],
                      tp["bias_ih_l0"], tp["bias_hh_l0"])
        h2, c2 = cell(h1, h2, c2, tp["weight_ih_l1"], tp["weight_hh_l1"],
                      tp["bias_ih_l1"], tp["bias_hh_l1"])
    return h2 @ tp["fc_weight"].T + tp["fc_bias"]


# ----------------------------------------------------------------------------- main
if __name__ == "__main__":
    key = jax.random.PRNGKey(0)
    k_x, k_p = jax.random.split(key)

    B, T = 2, 8
    x = jax.random.normal(k_x, (B, T, INPUT_SIZE), jnp.float32)

    torch_params = init_torch_params(k_p)
    kernel_params = pack_params(torch_params)

    out = jax.block_until_ready(rnn_forward(x, kernel_params))
    ref = rnn_reference(x, torch_params)

    assert out.shape == (B, OUTPUT_SIZE)
    assert jnp.allclose(out, ref, atol=1e-4, rtol=1e-4), (out, ref)

    print("KERNEL_OK")
</pallas_src>

<mosaic_0001>
module attributes {stable_mosaic.version = 11 : i64} {
  func.func @kernel(%arg0: memref<16x64xf32, #tpu.memory_space<vmem>>, %arg1: memref<64x256xf32, #tpu.memory_space<vmem>>, %arg2: memref<64x256xf32, #tpu.memory_space<vmem>>, %arg3: memref<1x256xf32, #tpu.memory_space<vmem>>, %arg4: memref<64x256xf32, #tpu.memory_space<vmem>>, %arg5: memref<64x256xf32, #tpu.memory_space<vmem>>, %arg6: memref<1x256xf32, #tpu.memory_space<vmem>>, %arg7: memref<1x64xf32, #tpu.memory_space<vmem>>, %arg8: memref<1x1xf32, #tpu.memory_space<vmem>>, %arg9: memref<2x1xf32, #tpu.memory_space<vmem>>) attributes {dimension_semantics = [], scalar_prefetch = 0 : i64, scratch_operands = 0 : i64, tpu.core_type = #tpu.core_type<tc>} {
    %c0 = arith.constant 0 : index
    %c0_0 = arith.constant 0 : index
    %0 = vector.load %arg0[%c0, %c0_0] : memref<16x64xf32, #tpu.memory_space<vmem>>, vector<16x64xf32>
    %c0_1 = arith.constant 0 : index
    %c0_2 = arith.constant 0 : index
    %1 = vector.load %arg1[%c0_1, %c0_2] : memref<64x256xf32, #tpu.memory_space<vmem>>, vector<64x256xf32>
    %cst = arith.constant dense<0.000000e+00> : vector<16x256xf32>
    %2 = tpu.matmul %0, %1, %cst {dimension_numbers = #tpu.dot_dimension_numbers<[1], [0], [0], [1], [0, 0, 1, 1], [], []>} : vector<16x64xf32>, vector<64x256xf32>, vector<16x256xf32> -> vector<16x256xf32>
    %c0_3 = arith.constant 0 : index
    %c0_4 = arith.constant 0 : index
    %3 = vector.load %arg3[%c0_3, %c0_4] : memref<1x256xf32, #tpu.memory_space<vmem>>, vector<1x256xf32>
    %4 = vector.broadcast %3 : vector<1x256xf32> to vector<16x256xf32>
    %5 = arith.addf %2, %4 : vector<16x256xf32>
    %c0_5 = arith.constant 0 : index
    %c0_6 = arith.constant 0 : index
    %6 = vector.load %arg2[%c0_5, %c0_6] : memref<64x256xf32, #tpu.memory_space<vmem>>, vector<64x256xf32>
    %c0_7 = arith.constant 0 : index
    %c0_8 = arith.constant 0 : index
    %7 = vector.load %arg5[%c0_7, %c0_8] : memref<64x256xf32, #tpu.memory_space<vmem>>, vector<64x256xf32>
    %cst_9 = arith.constant 0.000000e+00 : f32
    %8 = vector.broadcast %cst_9 : f32 to vector<2x64xf32>
    %9 = vector.extract_strided_slice %5 {offsets = [0, 0], sizes = [2, 256], strides = [1, 1]} : vector<16x256xf32> to vector<2x256xf32>
    %cst_10 = arith.constant dense<0.000000e+00> : vector<2x256xf32>
    %10 = tpu.matmul %8, %6, %cst_10 {dimension_numbers = #tpu.dot_dimension_numbers<[1], [0], [0], [1], [0, 0, 1, 1], [], []>} : vector<2x64xf32>, vector<64x256xf32>, vector<2x256xf32> -> vector<2x256xf32>
    %11 = arith.addf %9, %10 : vector<2x256xf32>
    %12 = vector.extract_strided_slice %11 {offsets = [0, 0], sizes = [2, 192], strides = [1, 1]} : vector<2x256xf32> to vector<2x192xf32>
    %13 = arith.negf %12 : vector<2x192xf32>
    %14 = math.exp %13 : vector<2x192xf32>
    %cst_11 = arith.constant 1.000000e+00 : f32
    %15 = vector.broadcast %cst_11 : f32 to vector<2x192xf32>
    %16 = arith.addf %15, %14 : vector<2x192xf32>
    %17 = arith.divf %15, %16 : vector<2x192xf32>
    %18 = vector.extract_strided_slice %11 {offsets = [0, 192], sizes = [2, 64], strides = [1, 1]} : vector<2x256xf32> to vector<2x64xf32>
    %19 = math.tanh %18 : vector<2x64xf32>
    %20 = vector.extract_strided_slice %17 {offsets = [0, 64], sizes = [2, 64], strides = [1, 1]} : vector<2x192xf32> to vector<2x64xf32>
    %21 = arith.mulf %20, %8 : vector<2x64xf32>
    %22 = vector.extract_strided_slice %17 {offsets = [0, 0], sizes = [2, 64], strides = [1, 1]} : vector<2x192xf32> to vector<2x64xf32>
    %23 = arith.mulf %22, %19 : vector<2x64xf32>
    %24 = arith.addf %21, %23 : vector<2x64xf32>
    %25 = vector.extract_strided_slice %17 {offsets = [0, 128], sizes = [2, 64], strides = [1, 1]} : vector<2x192xf32> to vector<2x64xf32>
    %26 = math.tanh %24 : vector<2x64xf32>
    %27 = arith.mulf %25, %26 : vector<2x64xf32>
    %28 = vector.extract_strided_slice %5 {offsets = [2, 0], sizes = [2, 256], strides = [1, 1]} : vector<16x256xf32> to vector<2x256xf32>
    %cst_12 = arith.constant dense<0.000000e+00> : vector<2x256xf32>
    %29 = tpu.matmul %27, %6, %cst_12 {dimension_numbers = #tpu.dot_dimension_numbers<[1], [0], [0], [1], [0, 0, 1, 1], [], []>} : vector<2x64xf32>, vector<64x256xf32>, vector<2x256xf32> -> vector<2x256xf32>
    %30 = arith.addf %28, %29 : vector<2x256xf32>
    %31 = vector.extract_strided_slice %30 {offsets = [0, 0], sizes = [2, 192], strides = [1, 1]} : vector<2x256xf32> to vector<2x192xf32>
    %32 = arith.negf %31 : vector<2x192xf32>
    %33 = math.exp %32 : vector<2x192xf32>
    %cst_13 = arith.constant 1.000000e+00 : f32
    %34 = vector.broadcast %cst_13 : f32 to vector<2x192xf32>
    %35 = arith.addf %34, %33 : vector<2x192xf32>
    %36 = arith.divf %34, %35 : vector<2x192xf32>
    %37 = vector.extract_strided_slice %30 {offsets = [0, 192], sizes = [2, 64], strides = [1, 1]} : vector<2x256xf32> to vector<2x64xf32>
    %38 = math.tanh %37 : vector<2x64xf32>
    %39 = vector.extract_strided_slice %36 {offsets = [0, 64], sizes = [2, 64], strides = [1, 1]} : vector<2x192xf32> to vector<2x64xf32>
    %40 = arith.mulf %39, %24 : vector<2x64xf32>
    %41 = vector.extract_strided_slice %36 {offsets = [0, 0], sizes = [2, 64], strides = [1, 1]} : vector<2x192xf32> to vector<2x64xf32>
    %42 = arith.mulf %41, %38 : vector<2x64xf32>
    %43 = arith.addf %40, %42 : vector<2x64xf32>
    %44 = vector.extract_strided_slice %36 {offsets = [0, 128], sizes = [2, 64], strides = [1, 1]} : vector<2x192xf32> to vector<2x64xf32>
    %45 = math.tanh %43 : vector<2x64xf32>
    %46 = arith.mulf %44, %45 : vector<2x64xf32>
    %47 = vector.extract_strided_slice %5 {offsets = [4, 0], sizes = [2, 256], strides = [1, 1]} : vector<16x256xf32> to vector<2x256xf32>
    %cst_14 = arith.constant dense<0.000000e+00> : vector<2x256xf32>
    %48 = tpu.matmul %46, %6, %cst_14 {dimension_numbers = #tpu.dot_dimension_numbers<[1], [0], [0], [1], [0, 0, 1, 1], [], []>} : vector<2x64xf32>, vector<64x256xf32>, vector<2x256xf32> -> vector<2x256xf32>
    %49 = arith.addf %47, %48 : vector<2x256xf32>
    %50 = vector.extract_strided_slice %49 {offsets = [0, 0], sizes = [2, 192], strides = [1, 1]} : vector<2x256xf32> to vector<2x192xf32>
    %51 = arith.negf %50 : vector<2x192xf32>
    %52 = math.exp %51 : vector<2x192xf32>
    %cst_15 = arith.constant 1.000000e+00 : f32
    %53 = vector.broadcast %cst_15 : f32 to vector<2x192xf32>
    %54 = arith.addf %53, %52 : vector<2x192xf32>
    %55 = arith.divf %53, %54 : vector<2x192xf32>
    %56 = vector.extract_strided_slice %49 {offsets = [0, 192], sizes = [2, 64], strides = [1, 1]} : vector<2x256xf32> to vector<2x64xf32>
    %57 = math.tanh %56 : vector<2x64xf32>
    %58 = vector.extract_strided_slice %55 {offsets = [0, 64], sizes = [2, 64], strides = [1, 1]} : vector<2x192xf32> to vector<2x64xf32>
    %59 = arith.mulf %58, %43 : vector<2x64xf32>
    %60 = vector.extract_strided_slice %55 {offsets = [0, 0], sizes = [2, 64], strides = [1, 1]} : vector<2x192xf32> to vector<2x64xf32>
    %61 = arith.mulf %60, %57 : vector<2x64xf32>
    %62 = arith.addf %59, %61 : vector<2x64xf32>
    %63 = vector.extract_strided_slice %55 {offsets = [0, 128], sizes = [2, 64], strides = [1, 1]} : vector<2x192xf32> to vector<2x64xf32>
    %64 = math.tanh %62 : vector<2x64xf32>
    %65 = arith.mulf %63, %64 : vector<2x64xf32>
    %66 = vector.extract_strided_slice %5 {offsets = [6, 0], sizes = [2, 256], strides = [1, 1]} : vector<16x256xf32> to vector<2x256xf32>
    %cst_16 = arith.constant dense<0.000000e+00> : vector<2x256xf32>
    %67 = tpu.matmul %65, %6, %cst_16 {dimension_numbers = #tpu.dot_dimension_numbers<[1], [0], [0], [1], [0, 0, 1, 1], [], []>} : vector<2x64xf32>, vector<64x256xf32>, vector<2x256xf32> -> vector<2x256xf32>
    %68 = arith.addf %66, %67 : vector<2x256xf32>
    %69 = vector.extract_strided_slice %68 {offsets = [0, 0], sizes = [2, 192], strides = [1, 1]} : vector<2x256xf32> to vector<2x192xf32>
    %70 = arith.negf %69 : vector<2x192xf32>
    %71 = math.exp %70 : vector<2x192xf32>
    %cst_17 = arith.constant 1.000000e+00 : f32
    %72 = vector.broadcast %cst_17 : f32 to vector<2x192xf32>
    %73 = arith.addf %72, %71 : vector<2x192xf32>
    %74 = arith.divf %72, %73 : vector<2x192xf32>
    %75 = vector.extract_strided_slice %68 {offsets = [0, 192], sizes = [2, 64], strides = [1, 1]} : vector<2x256xf32> to vector<2x64xf32>
    %76 = math.tanh %75 : vector<2x64xf32>
    %77 = vector.extract_strided_slice %74 {offsets = [0, 64], sizes = [2, 64], strides = [1, 1]} : vector<2x192xf32> to vector<2x64xf32>
    %78 = arith.mulf %77, %62 : vector<2x64xf32>
    %79 = vector.extract_strided_slice %74 {offsets = [0, 0], sizes = [2, 64], strides = [1, 1]} : vector<2x192xf32> to vector<2x64xf32>
    %80 = arith.mulf %79, %76 : vector<2x64xf32>
    %81 = arith.addf %78, %80 : vector<2x64xf32>
    %82 = vector.extract_strided_slice %74 {offsets = [0, 128], sizes = [2, 64], strides = [1, 1]} : vector<2x192xf32> to vector<2x64xf32>
    %83 = math.tanh %81 : vector<2x64xf32>
    %84 = arith.mulf %82, %83 : vector<2x64xf32>
    %85 = vector.extract_strided_slice %5 {offsets = [8, 0], sizes = [2, 256], strides = [1, 1]} : vector<16x256xf32> to vector<2x256xf32>
    %cst_18 = arith.constant dense<0.000000e+00> : vector<2x256xf32>
    %86 = tpu.matmul %84, %6, %cst_18 {dimension_numbers = #tpu.dot_dimension_numbers<[1], [0], [0], [1], [0, 0, 1, 1], [], []>} : vector<2x64xf32>, vector<64x256xf32>, vector<2x256xf32> -> vector<2x256xf32>
    %87 = arith.addf %85, %86 : vector<2x256xf32>
    %88 = vector.extract_strided_slice %87 {offsets = [0, 0], sizes = [2, 192], strides = [1, 1]} : vector<2x256xf32> to vector<2x192xf32>
    %89 = arith.negf %88 : vector<2x192xf32>
    %90 = math.exp %89 : vector<2x192xf32>
    %cst_19 = arith.constant 1.000000e+00 : f32
    %91 = vector.broadcast %cst_19 : f32 to vector<2x192xf32>
    %92 = arith.addf %91, %90 : vector<2x192xf32>
    %93 = arith.divf %91, %92 : vector<2x192xf32>
    %94 = vector.extract_strided_slice %87 {offsets = [0, 192], sizes = [2, 64], strides = [1, 1]} : vector<2x256xf32> to vector<2x64xf32>
    %95 = math.tanh %94 : vector<2x64xf32>
    %96 = vector.extract_strided_slice %93 {offsets = [0, 64], sizes = [2, 64], strides = [1, 1]} : vector<2x192xf32> to vector<2x64xf32>
    %97 = arith.mulf %96, %81 : vector<2x64xf32>
    %98 = vector.extract_strided_slice %93 {offsets = [0, 0], sizes = [2, 64], strides = [1, 1]} : vector<2x192xf32> to vector<2x64xf32>
    %99 = arith.mulf %98, %95 : vector<2x64xf32>
    %100 = arith.addf %97, %99 : vector<2x64xf32>
    %101 = vector.extract_strided_slice %93 {offsets = [0, 128], sizes = [2, 64], strides = [1, 1]} : vector<2x192xf32> to vector<2x64xf32>
    %102 = math.tanh %100 : vector<2x64xf32>
    %103 = arith.mulf %101, %102 : vector<2x64xf32>
    %104 = vector.extract_strided_slice %5 {offsets = [10, 0], sizes = [2, 256], strides = [1, 1]} : vector<16x256xf32> to vector<2x256xf32>
    %cst_20 = arith.constant dense<0.000000e+00> : vector<2x256xf32>
    %105 = tpu.matmul %103, %6, %cst_20 {dimension_numbers = #tpu.dot_dimension_numbers<[1], [0], [0], [1], [0, 0, 1, 1], [], []>} : vector<2x64xf32>, vector<64x256xf32>, vector<2x256xf32> -> vector<2x256xf32>
    %106 = arith.addf %104, %105 : vector<2x256xf32>
    %107 = vector.extract_strided_slice %106 {offsets = [0, 0], sizes = [2, 192], strides = [1, 1]} : vector<2x256xf32> to vector<2x192xf32>
    %108 = arith.negf %107 : vector<2x192xf32>
    %109 = math.exp %108 : vector<2x192xf32>
    %cst_21 = arith.constant 1.000000e+00 : f32
    %110 = vector.broadcast %cst_21 : f32 to vector<2x192xf32>
    %111 = arith.addf %110, %109 : vector<2x192xf32>
    %112 = arith.divf %110, %111 : vector<2x192xf32>
    %113 = vector.extract_strided_slice %106 {offsets = [0, 192], sizes = [2, 64], strides = [1, 1]} : vector<2x256xf32> to vector<2x64xf32>
    %114 = math.tanh %113 : vector<2x64xf32>
    %115 = vector.extract_strided_slice %112 {offsets = [0, 64], sizes = [2, 64], strides = [1, 1]} : vector<2x192xf32> to vector<2x64xf32>
    %116 = arith.mulf %115, %100 : vector<2x64xf32>
    %117 = vector.extract_strided_slice %112 {offsets = [0, 0], sizes = [2, 64], strides = [1, 1]} : vector<2x192xf32> to vector<2x64xf32>
    %118 = arith.mulf %117, %114 : vector<2x64xf32>
    %119 = arith.addf %116, %118 : vector<2x64xf32>
    %120 = vector.extract_strided_slice %112 {offsets = [0, 128], sizes = [2, 64], strides = [1, 1]} : vector<2x192xf32> to vector<2x64xf32>
    %121 = math.tanh %119 : vector<2x64xf32>
    %122 = arith.mulf %120, %121 : vector<2x64xf32>
    %123 = vector.extract_strided_slice %5 {offsets = [12, 0], sizes = [2, 256], strides = [1, 1]} : vector<16x256xf32> to vector<2x256xf32>
    %cst_22 = arith.constant dense<0.000000e+00> : vector<2x256xf32>
    %124 = tpu.matmul %122, %6, %cst_22 {dimension_numbers = #tpu.dot_dimension_numbers<[1], [0], [0], [1], [0, 0, 1, 1], [], []>} : vector<2x64xf32>, vector<64x256xf32>, vector<2x256xf32> -> vector<2x256xf32>
    %125 = arith.addf %123, %124 : vector<2x256xf32>
    %126 = vector.extract_strided_slice %125 {offsets = [0, 0], sizes = [2, 192], strides = [1, 1]} : vector<2x256xf32> to vector<2x192xf32>
    %127 = arith.negf %126 : vector<2x192xf32>
    %128 = math.exp %127 : vector<2x192xf32>
    %cst_23 = arith.constant 1.000000e+00 : f32
    %129 = vector.broadcast %cst_23 : f32 to vector<2x192xf32>
    %130 = arith.addf %129, %128 : vector<2x192xf32>
    %131 = arith.divf %129, %130 : vector<2x192xf32>
    %132 = vector.extract_strided_slice %125 {offsets = [0, 192], sizes = [2, 64], strides = [1, 1]} : vector<2x256xf32> to vector<2x64xf32>
    %133 = math.tanh %132 : vector<2x64xf32>
    %134 = vector.extract_strided_slice %131 {offsets = [0, 64], sizes = [2, 64], strides = [1, 1]} : vector<2x192xf32> to vector<2x64xf32>
    %135 = arith.mulf %134, %119 : vector<2x64xf32>
    %136 = vector.extract_strided_slice %131 {offsets = [0, 0], sizes = [2, 64], strides = [1, 1]} : vector<2x192xf32> to vector<2x64xf32>
    %137 = arith.mulf %136, %133 : vector<2x64xf32>
    %138 = arith.addf %135, %137 : vector<2x64xf32>
    %139 = vector.extract_strided_slice %131 {offsets = [0, 128], sizes = [2, 64], strides = [1, 1]} : vector<2x192xf32> to vector<2x64xf32>
    %140 = math.tanh %138 : vector<2x64xf32>
    %141 = arith.mulf %139, %140 : vector<2x64xf32>
    %142 = vector.extract_strided_slice %5 {offsets = [14, 0], sizes = [2, 256], strides = [1, 1]} : vector<16x256xf32> to vector<2x256xf32>
    %cst_24 = arith.constant dense<0.000000e+00> : vector<2x256xf32>
    %143 = tpu.matmul %141, %6, %cst_24 {dimension_numbers = #tpu.dot_dimension_numbers<[1], [0], [0], [1], [0, 0, 1, 1], [], []>} : vector<2x64xf32>, vector<64x256xf32>, vector<2x256xf32> -> vector<2x256xf32>
    %144 = arith.addf %142, %143 : vector<2x256xf32>
    %145 = vector.extract_strided_slice %144 {offsets = [0, 0], sizes = [2, 192], strides = [1, 1]} : vector<2x256xf32> to vector<2x192xf32>
    %146 = arith.negf %145 : vector<2x192xf32>
    %147 = math.exp %146 : vector<2x192xf32>
    %cst_25 = arith.constant 1.000000e+00 : f32
    %148 = vector.broadcast %cst_25 : f32 to vector<2x192xf32>
    %149 = arith.addf %148, %147 : vector<2x192xf32>
    %150 = arith.divf %148, %149 : vector<2x192xf32>
    %151 = vector.extract_strided_slice %144 {offsets = [0, 192], sizes = [2, 64], strides = [1, 1]} : vector<2x256xf32> to vector<2x64xf32>
    %152 = math.tanh %151 : vector<2x64xf32>
    %153 = vector.extract_strided_slice %150 {offsets = [0, 64], sizes = [2, 64], strides = [1, 1]} : vector<2x192xf32> to vector<2x64xf32>
    %154 = arith.mulf %153, %138 : vector<2x64xf32>
    %155 = vector.extract_strided_slice %150 {offsets = [0, 0], sizes = [2, 64], strides = [1, 1]} : vector<2x192xf32> to vector<2x64xf32>
    %156 = arith.mulf %155, %152 : vector<2x64xf32>
    %157 = arith.addf %154, %156 : vector<2x64xf32>
    %158 = vector.extract_strided_slice %150 {offsets = [0, 128], sizes = [2, 64], strides = [1, 1]} : vector<2x192xf32> to vector<2x64xf32>
    %159 = math.tanh %157 : vector<2x64xf32>
    %160 = arith.mulf %158, %159 : vector<2x64xf32>
    %161 = tpu.concatenate %27, %46, %65, %84, %103, %122, %141, %160 in 0 : vector<2x64xf32>, vector<2x64xf32>, vector<2x64xf32>, vector<2x64xf32>, vector<2x64xf32>, vector<2x64xf32>, vector<2x64xf32>, vector<2x64xf32> -> vector<16x64xf32>
    %c0_26 = arith.constant 0 : index
    %c0_27 = arith.constant 0 : index
    %162 = vector.load %arg4[%c0_26, %c0_27] : memref<64x256xf32, #tpu.memory_space<vmem>>, vector<64x256xf32>
    %cst_28 = arith.constant dense<0.000000e+00> : vector<16x256xf32>
    %163 = tpu.matmul %161, %162, %cst_28 {dimension_numbers = #tpu.dot_dimension_numbers<[1], [0], [0], [1], [0, 0, 1, 1], [], []>} : vector<16x64xf32>, vector<64x256xf32>, vector<16x256xf32> -> vector<16x256xf32>
    %c0_29 = arith.constant 0 : index
    %c0_30 = arith.constant 0 : index
    %164 = vector.load %arg6[%c0_29, %c0_30] : memref<1x256xf32, #tpu.memory_space<vmem>>, vector<1x256xf32>
    %165 = vector.broadcast %164 : vector<1x256xf32> to vector<16x256xf32>
    %166 = arith.addf %163, %165 : vector<16x256xf32>
    %167 = vector.extract_strided_slice %166 {offsets = [0, 0], sizes = [2, 256], strides = [1, 1]} : vector<16x256xf32> to vector<2x256xf32>
    %cst_31 = arith.constant dense<0.000000e+00> : vector<2x256xf32>
    %168 = tpu.matmul %8, %7, %cst_31 {dimension_numbers = #tpu.dot_dimension_numbers<[1], [0], [0], [1], [0, 0, 1, 1], [], []>} : vector<2x64xf32>, vector<64x256xf32>, vector<2x256xf32> -> vector<2x256xf32>
    %169 = arith.addf %167, %168 : vector<2x256xf32>
    %170 = vector.extract_strided_slice %169 {offsets = [0, 0], sizes = [2, 192], strides = [1, 1]} : vector<2x256xf32> to vector<2x192xf32>
    %171 = arith.negf %170 : vector<2x192xf32>
    %172 = math.exp %171 : vector<2x192xf32>
    %cst_32 = arith.constant 1.000000e+00 : f32
    %173 = vector.broadcast %cst_32 : f32 to vector<2x192xf32>
    %174 = arith.addf %173, %172 : vector<2x192xf32>
    %175 = arith.divf %173, %174 : vector<2x192xf32>
    %176 = vector.extract_strided_slice %169 {offsets = [0, 192], sizes = [2, 64], strides = [1, 1]} : vector<2x256xf32> to vector<2x64xf32>
    %177 = math.tanh %176 : vector<2x64xf32>
    %178 = vector.extract_strided_slice %175 {offsets = [0, 64], sizes = [2, 64], strides = [1, 1]} : vector<2x192xf32> to vector<2x64xf32>
    %179 = arith.mulf %178, %8 : vector<2x64xf32>
    %180 = vector.extract_strided_slice %175 {offsets = [0, 0], sizes = [2, 64], strides = [1, 1]} : vector<2x192xf32> to vector<2x64xf32>
    %181 = arith.mulf %180, %177 : vector<2x64xf32>
    %182 = arith.addf %179, %181 : vector<2x64xf32>
    %183 = vector.extract_strided_slice %175 {offsets = [0, 128], sizes = [2, 64], strides = [1, 1]} : vector<2x192xf32> to vector<2x64xf32>
    %184 = math.tanh %182 : vector<2x64xf32>
    %185 = arith.mulf %183, %184 : vector<2x64xf32>
    %186 = vector.extract_strided_slice %166 {offsets = [2, 0], sizes = [2, 256], strides = [1, 1]} : vector<16x256xf32> to vector<2x256xf32>
    %cst_33 = arith.constant dense<0.000000e+00> : vector<2x256xf32>
    %187 = tpu.matmul %185, %7, %cst_33 {dimension_numbers = #tpu.dot_dimension_numbers<[1], [0], [0], [1], [0, 0, 1, 1], [], []>} : vector<2x64xf32>, vector<64x256xf32>, vector<2x256xf32> -> vector<2x256xf32>
    %188 = arith.addf %186, %187 : vector<2x256xf32>
    %189 = vector.extract_strided_slice %188 {offsets = [0, 0], sizes = [2, 192], strides = [1, 1]} : vector<2x256xf32> to vector<2x192xf32>
    %190 = arith.negf %189 : vector<2x192xf32>
    %191 = math.exp %190 : vector<2x192xf32>
    %cst_34 = arith.constant 1.000000e+00 : f32
    %192 = vector.broadcast %cst_34 : f32 to vector<2x192xf32>
    %193 = arith.addf %192, %191 : vector<2x192xf32>
    %194 = arith.divf %192, %193 : vector<2x192xf32>
    %195 = vector.extract_strided_slice %188 {offsets = [0, 192], sizes = [2, 64], strides = [1, 1]} : vector<2x256xf32> to vector<2x64xf32>
    %196 = math.tanh %195 : vector<2x64xf32>
    %197 = vector.extract_strided_slice %194 {offsets = [0, 64], sizes = [2, 64], strides = [1, 1]} : vector<2x192xf32> to vector<2x64xf32>
    %198 = arith.mulf %197, %182 : vector<2x64xf32>
    %199 = vector.extract_strided_slice %194 {offsets = [0, 0], sizes = [2, 64], strides = [1, 1]} : vector<2x192xf32> to vector<2x64xf32>
    %200 = arith.mulf %199, %196 : vector<2x64xf32>
    %201 = arith.addf %198, %200 : vector<2x64xf32>
    %202 = vector.extract_strided_slice %194 {offsets = [0, 128], sizes = [2, 64], strides = [1, 1]} : vector<2x192xf32> to vector<2x64xf32>
    %203 = math.tanh %201 : vector<2x64xf32>
    %204 = arith.mulf %202, %203 : vector<2x64xf32>
    %205 = vector.extract_strided_slice %166 {offsets = [4, 0], sizes = [2, 256], strides = [1, 1]} : vector<16x256xf32> to vector<2x256xf32>
    %cst_35 = arith.constant dense<0.000000e+00> : vector<2x256xf32>
    %206 = tpu.matmul %204, %7, %cst_35 {dimension_numbers = #tpu.dot_dimension_numbers<[1], [0], [0], [1], [0, 0, 1, 1], [], []>} : vector<2x64xf32>, vector<64x256xf32>, vector<2x256xf32> -> vector<2x256xf32>
    %207 = arith.addf %205, %206 : vector<2x256xf32>
    %208 = vector.extract_strided_slice %207 {offsets = [0, 0], sizes = [2, 192], strides = [1, 1]} : vector<2x256xf32> to vector<2x192xf32>
    %209 = arith.negf %208 : vector<2x192xf32>
    %210 = math.exp %209 : vector<2x192xf32>
    %cst_36 = arith.constant 1.000000e+00 : f32
    %211 = vector.broadcast %cst_36 : f32 to vector<2x192xf32>
    %212 = arith.addf %211, %210 : vector<2x192xf32>
    %213 = arith.divf %211, %212 : vector<2x192xf32>
    %214 = vector.extract_strided_slice %207 {offsets = [0, 192], sizes = [2, 64], strides = [1, 1]} : vector<2x256xf32> to vector<2x64xf32>
    %215 = math.tanh %214 : vector<2x64xf32>
    %216 = vector.extract_strided_slice %213 {offsets = [0, 64], sizes = [2, 64], strides = [1, 1]} : vector<2x192xf32> to vector<2x64xf32>
    %217 = arith.mulf %216, %201 : vector<2x64xf32>
    %218 = vector.extract_strided_slice %213 {offsets = [0, 0], sizes = [2, 64], strides = [1, 1]} : vector<2x192xf32> to vector<2x64xf32>
    %219 = arith.mulf %218, %215 : vector<2x64xf32>
    %220 = arith.addf %217, %219 : vector<2x64xf32>
    %221 = vector.extract_strided_slice %213 {offsets = [0, 128], sizes = [2, 64], strides = [1, 1]} : vector<2x192xf32> to vector<2x64xf32>
    %222 = math.tanh %220 : vector<2x64xf32>
    %223 = arith.mulf %221, %222 : vector<2x64xf32>
    %224 = vector.extract_strided_slice %166 {offsets = [6, 0], sizes = [2, 256], strides = [1, 1]} : vector<16x256xf32> to vector<2x256xf32>
    %cst_37 = arith.constant dense<0.000000e+00> : vector<2x256xf32>
    %225 = tpu.matmul %223, %7, %cst_37 {dimension_numbers = #tpu.dot_dimension_numbers<[1], [0], [0], [1], [0, 0, 1, 1], [], []>} : vector<2x64xf32>, vector<64x256xf32>, vector<2x256xf32> -> vector<2x256xf32>
    %226 = arith.addf %224, %225 : vector<2x256xf32>
    %227 = vector.extract_strided_slice %226 {offsets = [0, 0], sizes = [2, 192], strides = [1, 1]} : vector<2x256xf32> to vector<2x192xf32>
    %228 = arith.negf %227 : vector<2x192xf32>
    %229 = math.exp %228 : vector<2x192xf32>
    %cst_38 = arith.constant 1.000000e+00 : f32
    %230 = vector.broadcast %cst_38 : f32 to vector<2x192xf32>
    %231 = arith.addf %230, %229 : vector<2x192xf32>
    %232 = arith.divf %230, %231 : vector<2x192xf32>
    %233 = vector.extract_strided_slice %226 {offsets = [0, 192], sizes = [2, 64], strides = [1, 1]} : vector<2x256xf32> to vector<2x64xf32>
    %234 = math.tanh %233 : vector<2x64xf32>
    %235 = vector.extract_strided_slice %232 {offsets = [0, 64], sizes = [2, 64], strides = [1, 1]} : vector<2x192xf32> to vector<2x64xf32>
    %236 = arith.mulf %235, %220 : vector<2x64xf32>
    %237 = vector.extract_strided_slice %232 {offsets = [0, 0], sizes = [2, 64], strides = [1, 1]} : vector<2x192xf32> to vector<2x64xf32>
    %238 = arith.mulf %237, %234 : vector<2x64xf32>
    %239 = arith.addf %236, %238 : vector<2x64xf32>
    %240 = vector.extract_strided_slice %232 {offsets = [0, 128], sizes = [2, 64], strides = [1, 1]} : vector<2x192xf32> to vector<2x64xf32>
    %241 = math.tanh %239 : vector<2x64xf32>
    %242 = arith.mulf %240, %241 : vector<2x64xf32>
    %243 = vector.extract_strided_slice %166 {offsets = [8, 0], sizes = [2, 256], strides = [1, 1]} : vector<16x256xf32> to vector<2x256xf32>
    %cst_39 = arith.constant dense<0.000000e+00> : vector<2x256xf32>
    %244 = tpu.matmul %242, %7, %cst_39 {dimension_numbers = #tpu.dot_dimension_numbers<[1], [0], [0], [1], [0, 0, 1, 1], [], []>} : vector<2x64xf32>, vector<64x256xf32>, vector<2x256xf32> -> vector<2x256xf32>
    %245 = arith.addf %243, %244 : vector<2x256xf32>
    %246 = vector.extract_strided_slice %245 {offsets = [0, 0], sizes = [2, 192], strides = [1, 1]} : vector<2x256xf32> to vector<2x192xf32>
    %247 = arith.negf %246 : vector<2x192xf32>
    %248 = math.exp %247 : vector<2x192xf32>
    %cst_40 = arith.constant 1.000000e+00 : f32
    %249 = vector.broadcast %cst_40 : f32 to vector<2x192xf32>
    %250 = arith.addf %249, %248 : vector<2x192xf32>
    %251 = arith.divf %249, %250 : vector<2x192xf32>
    %252 = vector.extract_strided_slice %245 {offsets = [0, 192], sizes = [2, 64], strides = [1, 1]} : vector<2x256xf32> to vector<2x64xf32>
    %253 = math.tanh %252 : vector<2x64xf32>
    %254 = vector.extract_strided_slice %251 {offsets = [0, 64], sizes = [2, 64], strides = [1, 1]} : vector<2x192xf32> to vector<2x64xf32>
    %255 = arith.mulf %254, %239 : vector<2x64xf32>
    %256 = vector.extract_strided_slice %251 {offsets = [0, 0], sizes = [2, 64], strides = [1, 1]} : vector<2x192xf32> to vector<2x64xf32>
    %257 = arith.mulf %256, %253 : vector<2x64xf32>
    %258 = arith.addf %255, %257 : vector<2x64xf32>
    %259 = vector.extract_strided_slice %251 {offsets = [0, 128], sizes = [2, 64], strides = [1, 1]} : vector<2x192xf32> to vector<2x64xf32>
    %260 = math.tanh %258 : vector<2x64xf32>
    %261 = arith.mulf %259, %260 : vector<2x64xf32>
    %262 = vector.extract_strided_slice %166 {offsets = [10, 0], sizes = [2, 256], strides = [1, 1]} : vector<16x256xf32> to vector<2x256xf32>
    %cst_41 = arith.constant dense<0.000000e+00> : vector<2x256xf32>
    %263 = tpu.matmul %261, %7, %cst_41 {dimension_numbers = #tpu.dot_dimension_numbers<[1], [0], [0], [1], [0, 0, 1, 1], [], []>} : vector<2x64xf32>, vector<64x256xf32>, vector<2x256xf32> -> vector<2x256xf32>
    %264 = arith.addf %262, %263 : vector<2x256xf32>
    %265 = vector.extract_strided_slice %264 {offsets = [0, 0], sizes = [2, 192], strides = [1, 1]} : vector<2x256xf32> to vector<2x192xf32>
    %266 = arith.negf %265 : vector<2x192xf32>
    %267 = math.exp %266 : vector<2x192xf32>
    %cst_42 = arith.constant 1.000000e+00 : f32
    %268 = vector.broadcast %cst_42 : f32 to vector<2x192xf32>
    %269 = arith.addf %268, %267 : vector<2x192xf32>
    %270 = arith.divf %268, %269 : vector<2x192xf32>
    %271 = vector.extract_strided_slice %264 {offsets = [0, 192], sizes = [2, 64], strides = [1, 1]} : vector<2x256xf32> to vector<2x64xf32>
    %272 = math.tanh %271 : vector<2x64xf32>
    %273 = vector.extract_strided_slice %270 {offsets = [0, 64], sizes = [2, 64], strides = [1, 1]} : vector<2x192xf32> to vector<2x64xf32>
    %274 = arith.mulf %273, %258 : vector<2x64xf32>
    %275 = vector.extract_strided_slice %270 {offsets = [0, 0], sizes = [2, 64], strides = [1, 1]} : vector<2x192xf32> to vector<2x64xf32>
    %276 = arith.mulf %275, %272 : vector<2x64xf32>
    %277 = arith.addf %274, %276 : vector<2x64xf32>
    %278 = vector.extract_strided_slice %270 {offsets = [0, 128], sizes = [2, 64], strides = [1, 1]} : vector<2x192xf32> to vector<2x64xf32>
    %279 = math.tanh %277 : vector<2x64xf32>
    %280 = arith.mulf %278, %279 : vector<2x64xf32>
    %281 = vector.extract_strided_slice %166 {offsets = [12, 0], sizes = [2, 256], strides = [1, 1]} : vector<16x256xf32> to vector<2x256xf32>
    %cst_43 = arith.constant dense<0.000000e+00> : vector<2x256xf32>
    %282 = tpu.matmul %280, %7, %cst_43 {dimension_numbers = #tpu.dot_dimension_numbers<[1], [0], [0], [1], [0, 0, 1, 1], [], []>} : vector<2x64xf32>, vector<64x256xf32>, vector<2x256xf32> -> vector<2x256xf32>
    %283 = arith.addf %281, %282 : vector<2x256xf32>
    %284 = vector.extract_strided_slice %283 {offsets = [0, 0], sizes = [2, 192], strides = [1, 1]} : vector<2x256xf32> to vector<2x192xf32>
    %285 = arith.negf %284 : vector<2x192xf32>
    %286 = math.exp %285 : vector<2x192xf32>
    %cst_44 = arith.constant 1.000000e+00 : f32
    %287 = vector.broadcast %cst_44 : f32 to vector<2x192xf32>
    %288 = arith.addf %287, %286 : vector<2x192xf32>
    %289 = arith.divf %287, %288 : vector<2x192xf32>
    %290 = vector.extract_strided_slice %283 {offsets = [0, 192], sizes = [2, 64], strides = [1, 1]} : vector<2x256xf32> to vector<2x64xf32>
    %291 = math.tanh %290 : vector<2x64xf32>
    %292 = vector.extract_strided_slice %289 {offsets = [0, 64], sizes = [2, 64], strides = [1, 1]} : vector<2x192xf32> to vector<2x64xf32>
    %293 = arith.mulf %292, %277 : vector<2x64xf32>
    %294 = vector.extract_strided_slice %289 {offsets = [0, 0], sizes = [2, 64], strides = [1, 1]} : vector<2x192xf32> to vector<2x64xf32>
    %295 = arith.mulf %294, %291 : vector<2x64xf32>
    %296 = arith.addf %293, %295 : vector<2x64xf32>
    %297 = vector.extract_strided_slice %289 {offsets = [0, 128], sizes = [2, 64], strides = [1, 1]} : vector<2x192xf32> to vector<2x64xf32>
    %298 = math.tanh %296 : vector<2x64xf32>
    %299 = arith.mulf %297, %298 : vector<2x64xf32>
    %300 = vector.extract_strided_slice %166 {offsets = [14, 0], sizes = [2, 256], strides = [1, 1]} : vector<16x256xf32> to vector<2x256xf32>
    %cst_45 = arith.constant dense<0.000000e+00> : vector<2x256xf32>
    %301 = tpu.matmul %299, %7, %cst_45 {dimension_numbers = #tpu.dot_dimension_numbers<[1], [0], [0], [1], [0, 0, 1, 1], [], []>} : vector<2x64xf32>, vector<64x256xf32>, vector<2x256xf32> -> vector<2x256xf32>
    %302 = arith.addf %300, %301 : vector<2x256xf32>
    %303 = vector.extract_strided_slice %302 {offsets = [0, 0], sizes = [2, 192], strides = [1, 1]} : vector<2x256xf32> to vector<2x192xf32>
    %304 = arith.negf %303 : vector<2x192xf32>
    %305 = math.exp %304 : vector<2x192xf32>
    %cst_46 = arith.constant 1.000000e+00 : f32
    %306 = vector.broadcast %cst_46 : f32 to vector<2x192xf32>
    %307 = arith.addf %306, %305 : vector<2x192xf32>
    %308 = arith.divf %306, %307 : vector<2x192xf32>
    %309 = vector.extract_strided_slice %302 {offsets = [0, 192], sizes = [2, 64], strides = [1, 1]} : vector<2x256xf32> to vector<2x64xf32>
    %310 = math.tanh %309 : vector<2x64xf32>
    %311 = vector.extract_strided_slice %308 {offsets = [0, 64], sizes = [2, 64], strides = [1, 1]} : vector<2x192xf32> to vector<2x64xf32>
    %312 = arith.mulf %311, %296 : vector<2x64xf32>
    %313 = vector.extract_strided_slice %308 {offsets = [0, 0], sizes = [2, 64], strides = [1, 1]} : vector<2x192xf32> to vector<2x64xf32>
    %314 = arith.mulf %313, %310 : vector<2x64xf32>
    %315 = arith.addf %312, %314 : vector<2x64xf32>
    %316 = vector.extract_strided_slice %308 {offsets = [0, 128], sizes = [2, 64], strides = [1, 1]} : vector<2x192xf32> to vector<2x64xf32>
    %317 = math.tanh %315 : vector<2x64xf32>
    %318 = arith.mulf %316, %317 : vector<2x64xf32>
    %c0_47 = arith.constant 0 : index
    %c0_48 = arith.constant 0 : index
    %319 = vector.load %arg7[%c0_47, %c0_48] : memref<1x64xf32, #tpu.memory_space<vmem>>, vector<1x64xf32>
    %320 = vector.broadcast %319 : vector<1x64xf32> to vector<2x64xf32>
    %321 = arith.mulf %318, %320 : vector<2x64xf32>
    %cst_49 = arith.constant dense<0.000000e+00> : vector<2xf32>
    %322 = vector.multi_reduction <add>, %321, %cst_49 [1] : vector<2x64xf32> to vector<2xf32>
    %323 = vector.shape_cast %322 : vector<2xf32> to vector<2x1xf32>
    %c0_50 = arith.constant 0 : index
    %c0_51 = arith.constant 0 : index
    %324 = vector.load %arg8[%c0_50, %c0_51] : memref<1x1xf32, #tpu.memory_space<vmem>>, vector<1x1xf32>
    %325 = vector.broadcast %324 : vector<1x1xf32> to vector<2x1xf32>
    %326 = arith.addf %323, %325 : vector<2x1xf32>
    %c0_52 = arith.constant 0 : index
    %c0_53 = arith.constant 0 : index
    %327 = vector.load %arg9[%c0_52, %c0_53] : memref<2x1xf32, #tpu.memory_space<vmem>>, vector<2x1xf32>
    tpu.vector_store %arg9[%c0_52, %c0_53], %326 {strides = array<i32>} : memref<2x1xf32, #tpu.memory_space<vmem>>, vector<2x1xf32>,
    return
  }
}

</mosaic_0001>

<bundles_post_ra>
// kernel: tpu_custom_call.1
= control target key start
LH: loop header
LB: loop body
LE: loop exit
PB: predicated region body
PF: predicated region fallthrough
CT: control target
= control target key end

     0   :  { %s3395_s0 = inlined_call_operand.hbm [shape: f32[16,64], index: 0, kind: input, shape index: {}]   ;;  %s3396_s1 = inlined_call_operand.hbm [shape: f32[64,256], index: 1, kind: input, shape index: {}]   ;;  %s3397_s2 = inlined_call_operand.hbm [shape: f32[64,256], index: 2, kind: input, shape index: {}]   ;;  %s3398_s3 = inlined_call_operand.vmem [shape: f32[1,256], index: 3, kind: input, shape index: {}]   ;;  %s3399_s4 = inlined_call_operand.hbm [shape: f32[64,256], index: 4, kind: input, shape index: {}]   ;;  %s3400_s5 = inlined_call_operand.hbm [shape: f32[64,256], index: 5, kind: input, shape index: {}]   ;;  %s3401_s6 = inlined_call_operand.vmem [shape: f32[1,256], index: 6, kind: input, shape index: {}]   ;;  %s3402_s7 = inlined_call_operand.vmem [shape: f32[1,64], index: 7, kind: input, shape index: {}]   ;;  %s3403_s8 = inlined_call_operand.<no memory space> [shape: f32[1,1], index: 8, kind: input, shape index: {}]   ;;  %s3404_s9 = inlined_call_operand.vmem [shape: f32[2,1], index: 9, kind: output, shape index: {}]  }
   0x1   :  { %v14_v0 = vstv %s3403_s8 }
   0x2   :  { %15 = vst [vmem:[#allocation2] sm:$0x1] %v14_v0 }
   0x3   :  { %16 = vsyncpa [#allocation4], 0 }
   0x4   :  { %17 = vsyncpa [#allocation6], 0 }
   0x5   :  { %18 = vsyncpa [#allocation9], 0  ;;  %s2873_s11 = smov [#allocation5]   ;;  %s2757_s15 = scalar_lea.hbm %s3396_s1, 2048 }
   0x6   :  { %s36_s12 = sshll.u32 %s2873_s11, 4  ;;  %p2758_p0 = scmp.ne.s32.totalorder %s3396_s1, %s2757_s15  ;;  %s37_s12 = int_to_ptr.vmem [resolvable:$true] %s36_s12 }
   0x7   :  { %p2761_p1 = scmp.lt.u32.totalorder %s2757_s15, %s3396_s1 }
   0x9   :  { %p2763_p2 = pnand %p2761_p1, %p2758_p0 }
   0xb   :  { %2766 = shalt.err (!%p2763_p2)
}
   0xc   :  { %s2767_s8 = scalar_lea.vmem %s37_s12, 2048  ;;  %p2772_p4 = scmp.lt.s32.totalorder %s37_s12, %s37_s12 }
   0xd   :  { %p2768_p3 = scmp.ne.s32.totalorder %s37_s12, %s2767_s8  ;;  %p2773_p5 = scmp.lt.s32.totalorder %s2767_s8, %s2767_s8 }
   0xf   :  { %p2774_p6 = por %p2773_p5, %p2772_p4 }
  0x11   :  { %p2775_p7 = pnand %p2774_p6, %p2768_p3 }
  0x13   :  { %2778 = shalt.err (!%p2775_p7)
}
  0x14   :  { %s2874_s20 = smov 256   ;;  %s2875_s21 = smov 16  }
  0x15   :  { %42 = dma.hbm_to_vmem [thread:$0]  %s3396_s1, 2048, %s37_s12, [#allocation6], %s2874_s20, %s2874_s20, %s2875_s21  }
  0x16   :  { %s2876_s24 = smov [#allocation8]   ;;  %s2877_s26 = smov [#allocation3]  }
  0x17   :  { %s62_s25 = sshll.u32 %s2876_s24, 4  ;;  %s24_s27 = sshll.u32 %s2877_s26, 4  ;;  %s63_s25 = int_to_ptr.vmem [resolvable:$true] %s62_s25  ;;  %s25_s27 = int_to_ptr.vmem [resolvable:$true] %s24_s27 }
  0x18   :  { %s2779_s30 = scalar_lea.hbm %s3399_s4, 2048 }
  0x19   :  { %p2780_p8 = scmp.ne.s32.totalorder %s3399_s4, %s2779_s30  ;;  %p2783_p9 = scmp.lt.u32.totalorder %s2779_s30, %s3399_s4 }
  0x1b   :  { %p2785_p10 = pnand %p2783_p9, %p2780_p8 }
  0x1d   :  { %2788 = shalt.err (!%p2785_p10)
}
  0x1e   :  { %s2789_s1 = scalar_lea.vmem %s63_s25, 2048  ;;  %p2794_p12 = scmp.lt.s32.totalorder %s63_s25, %s63_s25 }
  0x1f   :  { %p2790_p11 = scmp.ne.s32.totalorder %s63_s25, %s2789_s1  ;;  %p2795_p13 = scmp.lt.s32.totalorder %s2789_s1, %s2789_s1 }
  0x21   :  { %p2796_p0 = por %p2795_p13, %p2794_p12 }
  0x23   :  { %p2797_p1 = pnand %p2796_p0, %p2790_p11 }
  0x25   :  { %2800 = shalt.err (!%p2797_p1)
}
  0x26   :  { %68 = dma.hbm_to_vmem [thread:$0]  %s3399_s4, 2048, %s63_s25, [#allocation9], %s2874_s20, %s2874_s20, %s2875_s21  }
  0x27   :  { %s2801_s18 = scalar_lea.hbm %s3395_s0, 256 }
  0x28   :  { %p2802_p2 = scmp.ne.s32.totalorder %s3395_s0, %s2801_s18  ;;  %p2805_p3 = scmp.lt.u32.totalorder %s2801_s18, %s3395_s0 }
  0x2a   :  { %p2807_p4 = pnand %p2805_p3, %p2802_p2 }
  0x2c   :  { %2810 = shalt.err (!%p2807_p4)
}
  0x2d   :  { %s2811_s24 = scalar_lea.vmem %s25_s27, 256  ;;  %p2816_p6 = scmp.lt.s32.totalorder %s25_s27, %s25_s27 }
  0x2e   :  { %p2812_p5 = scmp.ne.s32.totalorder %s25_s27, %s2811_s24  ;;  %p2817_p7 = scmp.lt.s32.totalorder %s2811_s24, %s2811_s24 }
  0x30   :  { %p2818_p8 = por %p2817_p7, %p2816_p6 }
  0x32   :  { %p2819_p9 = pnand %p2818_p8, %p2812_p5 }
  0x34   :  { %2822 = shalt.err (!%p2819_p9)
}
  0x35   :  { %s2878_s4 = smov 128   ;;  %s2879_s25 = smov 8  }
  0x36   :  { %30 = dma.hbm_to_vmem [thread:$0]  %s3395_s0, 256, %s25_s27, [#allocation4], %s2878_s4, %s2878_s4, %s2879_s25  }
  0x37   :  { %s2880_s29 = smov [#allocation7]   ;;  %s2881_s10 = smov [#allocation10]  }
  0x38   :  { %s48_s30 = sshll.u32 %s2880_s29, 4  ;;  %s74_s11 = sshll.u32 %s2881_s10, 4  ;;  %s49_s30 = int_to_ptr.vmem [resolvable:$true] %s48_s30  ;;  %s75_s11 = int_to_ptr.vmem [resolvable:$true] %s74_s11 }
  0x39   :  { %s2823_s1 = scalar_lea.hbm %s3397_s2, 2048 }
  0x3a   :  { %p2824_p10 = scmp.ne.s32.totalorder %s3397_s2, %s2823_s1  ;;  %p2827_p11 = scmp.lt.u32.totalorder %s2823_s1, %s3397_s2 }
  0x3c   :  { %p2829_p12 = pnand %p2827_p11, %p2824_p10 }
  0x3e   :  { %2832 = shalt.err (!%p2829_p12)
}
  0x3f   :  { %s2833_s0 = scalar_lea.vmem %s49_s30, 2048  ;;  %p2838_p0 = scmp.lt.s32.totalorder %s49_s30, %s49_s30 }
  0x40   :  { %p2834_p13 = scmp.ne.s32.totalorder %s49_s30, %s2833_s0  ;;  %p2839_p1 = scmp.lt.s32.totalorder %s2833_s0, %s2833_s0 }
  0x42   :  { %p2840_p2 = por %p2839_p1, %p2838_p0 }
  0x44   :  { %p2841_p3 = pnand %p2840_p2, %p2834_p13 }
  0x46   :  { %2844 = shalt.err (!%p2841_p3)
}
  0x47   :  { %54 = dma.hbm_to_vmem [thread:$0]  %s3397_s2, 2048, %s49_s30, [#allocation6], %s2874_s20, %s2874_s20, %s2875_s21  }
  0x48   :  { %s2845_s22 = scalar_lea.hbm %s3400_s5, 2048 }
  0x49   :  { %p2846_p4 = scmp.ne.s32.totalorder %s3400_s5, %s2845_s22  ;;  %p2849_p5 = scmp.lt.u32.totalorder %s2845_s22, %s3400_s5 }
  0x4b   :  { %p2851_p6 = pnand %p2849_p5, %p2846_p4 }
  0x4d   :  { %2854 = shalt.err (!%p2851_p6)
}
  0x4e   :  { %s2855_s26 = scalar_lea.vmem %s75_s11, 2048  ;;  %p2860_p8 = scmp.lt.s32.totalorder %s75_s11, %s75_s11 }
  0x4f   :  { %p2856_p7 = scmp.ne.s32.totalorder %s75_s11, %s2855_s26  ;;  %p2861_p9 = scmp.lt.s32.totalorder %s2855_s26, %s2855_s26 }
  0x51   :  { %p2862_p10 = por %p2861_p9, %p2860_p8 }
  0x53   :  { %p2863_p11 = pnand %p2862_p10, %p2856_p7 }
  0x55   :  { %2866 = shalt.err (!%p2863_p11)
}
  0x56   :  { %80 = dma.hbm_to_vmem [thread:$0]  %s3400_s5, 2048, %s75_s11, [#allocation9], %s2874_s20, %s2874_s20, %s2875_s21  }
  0x57   :  { %2867 = dma.done.wait [#allocation4], 256  }
  0x58   :  { %2868 = vsyncadd [#allocation4], 4294967040 }
  0x59   :  { %2869 = dma.done.wait [#allocation6], 4096  }
  0x5a   :  { %2870 = vsyncadd [#allocation6], 4294963200 }
  0x5b   :  { %2871 = dma.done.wait [#allocation9], 4096  }
  0x5c   :  { %2872 = vsyncadd [#allocation9], 4294963200  ;;  %v2882_v1 = vmov 0.0   ;;  %v105_v2 = vld [vmem:[#allocation5 + $0x8] sm:$0xff]  ;;  %v107_v3 = vld [vmem:[#allocation5 + $0x18] sm:$0xff]  ;;  %vm132_vm0 = vcmask 523264   ;;  %v122_v51 = vlaneseq }
  0x5d   :  { %203 = vmatprep.mubr.f32.mxu0 %v2882_v1  ;;  %315 = vmatprep.mubr.f32.mxu1 %v2882_v1  ;;  %v104_v4 = vld [vmem:[#allocation5] sm:$0xff]  ;;  %v2266_v5 = vpack.c.bf16 %v107_v3, %v105_v2  ;;  %v106_v6 = vld [vmem:[#allocation5 + $0x10] sm:$0xff]  ;;  %v217_v7 = vld [vmem:[#allocation7 + $0x8] sm:$0xff]  ;;  %s2883_s21 = smov 64   ;;  %vm1158_vm1 = vcmask 1041408   ;;  %vm1160_vm2 = vcmask 1043456  }
  0x5e   :  { %v219_v8 = vld [vmem:[#allocation7 + $0x18] sm:$0xff]  ;;  %v2268_v9 = vpack.c.bf16 %v106_v6, %v104_v4  ;;  %v216_v11 = vld [vmem:[#allocation7] sm:$0xff]  ;;  %v218_v12 = vld [vmem:[#allocation7 + $0x10] sm:$0xff]  ;;  %v3057_v52 = vshrl.u32 %v122_v51, 7  ;;  %vm1162_vm3 = vcmask 1045504   ;;  %vm2193_vm4 = vcmask 523270  }
  0x5f   :  { %v3011_v10 = vpack.c.bf16 %v219_v8, %v217_v7  ;;  %v109_v13 = vld [vmem:[#allocation5 + $0x28] sm:$0xff]  ;;  %2267 = vmatprep.subr.bf16.mxu0 %v2266_v5  ;;  %v3013_v14 = vpack.c.bf16 %v218_v12, %v216_v11  ;;  %v111_v15 = vld [vmem:[#allocation5 + $0x38] sm:$0xff]  ;;  %v108_v16 = vld [vmem:[#allocation5 + $0x20] sm:$0xff]  ;;  %vm2205_vm5 = vcmask 7174  }
  0x60   :  { %v110_v17 = vld [vmem:[#allocation5 + $0x30] sm:$0xff]  ;;  %2269 = vmatpush1.bf16.msra.mxu0 %v2268_v9  ;;  %v2270_v18 = vpack.c.bf16 %v111_v15, %v109_v13  ;;  %v221_v20 = vld [vmem:[#allocation7 + $0x28] sm:$0xff]  ;;  %v223_v21 = vld [vmem:[#allocation7 + $0x38] sm:$0xff]  ;;  %v128_v53 = vsub.s32 1, %v3057_v52  ;;  %v124_v63 = vsub.s32 0, %v3057_v52 }
  0x61   :  { %2283 = vmatprep.subr.bf16.mxu1 %v3011_v10  ;;  %v2272_v19 = vpack.c.bf16 %v110_v17, %v108_v16  ;;  %v220_v22 = vld [vmem:[#allocation7 + $0x20] sm:$0xff]  ;;  %v3017_v23 = vpack.c.bf16 %v223_v21, %v221_v20  ;;  %v222_v24 = vld [vmem:[#allocation7 + $0x30] sm:$0xff]  ;;  %v113_v25 = vld [vmem:[#allocation5 + $0x48] sm:$0xff] }
  0x62   :  { %2285 = vmatpush1.bf16.msra.mxu1 %v3013_v14  ;;  %v115_v26 = vld [vmem:[#allocation5 + $0x58] sm:$0xff]  ;;  %2271 = vmatprep.subr.bf16.mxu0 %v2270_v18  ;;  %v3019_v27 = vpack.c.bf16 %v222_v24, %v220_v22  ;;  %v112_v29 = vld [vmem:[#allocation5 + $0x40] sm:$0xff]  ;;  %v114_v30 = vld [vmem:[#allocation5 + $0x50] sm:$0xff] }
  0x63   :  { %v2274_v28 = vpack.c.bf16 %v115_v26, %v113_v25  ;;  %v225_v31 = vld [vmem:[#allocation7 + $0x48] sm:$0xff]  ;;  %2287 = vmatprep.subr.bf16.mxu1 %v3017_v23  ;;  %v227_v32 = vld [vmem:[#allocation7 + $0x58] sm:$0xff]  ;;  %v224_v33 = vld [vmem:[#allocation7 + $0x40] sm:$0xff]  ;;  %v2276_v35 = vpack.c.bf16 %v114_v30, %v112_v29 }
  0x64   :  { %v226_v34 = vld [vmem:[#allocation7 + $0x50] sm:$0xff]  ;;  %2273 = vmatpush1.bf16.msra.mxu0 %v2272_v19  ;;  %v3022_v36 = vpack.c.bf16 %v227_v32, %v225_v31  ;;  %v117_v37 = vld [vmem:[#allocation5 + $0x68] sm:$0xff]  ;;  %v119_v38 = vld [vmem:[#allocation5 + $0x78] sm:$0xff] }
  0x65   :  { %v116_v39 = vld [vmem:[#allocation5 + $0x60] sm:$0xff]  ;;  %2275 = vmatprep.subr.bf16.mxu0 %v2274_v28  ;;  %v3025_v40 = vpack.c.bf16 %v226_v34, %v224_v33  ;;  %v2278_v41 = vpack.c.bf16 %v119_v38, %v117_v37  ;;  %v118_v42 = vld [vmem:[#allocation5 + $0x70] sm:$0xff]  ;;  %v229_v43 = vld [vmem:[#allocation7 + $0x68] sm:$0xff] }
  0x66   :  { %2289 = vmatpush1.bf16.msra.mxu1 %v3019_v27  ;;  %v231_v44 = vld [vmem:[#allocation7 + $0x78] sm:$0xff]  ;;  %v228_v46 = vld [vmem:[#allocation7 + $0x60] sm:$0xff]  ;;  %v230_v47 = vld [vmem:[#allocation7 + $0x70] sm:$0xff]  ;;  %v2280_v48 = vpack.c.bf16 %v118_v42, %v116_v39 }
  0x67   :  { %2291 = vmatprep.subr.bf16.mxu1 %v3022_v36  ;;  %v3028_v45 = vpack.c.bf16 %v231_v44, %v229_v43  ;;  %v3031_v49 = vpack.c.bf16 %v230_v47, %v228_v46  ;;  %v102_v50 = vld [vmem:[#allocation3] sm:$0xff]  ;;  %v103_v11 = vld [vmem:[#allocation3 + $0x8] sm:$0xff] }
  0x68   :  { %2277 = vmatpush1.bf16.msra.mxu0 %v2276_v35  ;;  %v120_v54 = vld [vmem:[%s3398_s3] sm:$0x3] }
  0x69   :  { %2279 = vmatprep.subr.bf16.mxu0 %v2278_v41  ;;  %v3065_v55 = vrot.slane %v120_v54, %v128_v53  ;;  %v3075_v0 = vrot.slane %v120_v54, %v124_v63 }
  0x6a   :  { %2293 = vmatpush1.bf16.msra.mxu1 %v3025_v40 }
  0x6b   :  { %2295 = vmatprep.subr.bf16.mxu1 %v3028_v45 }
  0x6c   :  { %2281 = vmatpush1.bf16.msra.mxu0 %v2280_v48 }
  0x6d   :  { %2299 = vmatprep.subr.bf16.mxu0 %v3011_v10 }
  0x6e   :  { %2297 = vmatpush1.bf16.msra.mxu1 %v3031_v49 }
  0x6f   :  { %2315 = vmatprep.subr.bf16.mxu1 %v3011_v10  ;;  %2214 = vmatmul.mubr.msk.f32.vlgmr.msra.gmra.mrb[0].mxu0 %vm132_vm0, %v102_v50 }
  0x70   :  { %2301 = vmatpush1.bf16.msra.mxu0 %v3013_v14  ;;  %209 = vmatprep.mubr.f32.mxu0 %v2882_v1 }
  0x71   :  { %316 = vmatmul.mubr.f32.vlgmr.msra.gmra.mrb[0].mxu1 %v2882_v1  ;;  %2303 = vmatprep.subr.bf16.mxu0 %v3017_v23 }
  0x72   :  { %2317 = vmatpush1.bf16.msra.mxu1 %v3013_v14  ;;  %537 = vmatprep.mubr.f32.mxu1 %v2882_v1 }
  0x73   :  { %2319 = vmatprep.subr.bf16.mxu1 %v3017_v23  ;;  %2215 = vmatmul.mubr.msk.f32.gmra.mrb[2].mxu0 %vm132_vm0, %v103_v11 }
  0x74   :  { %2305 = vmatpush1.bf16.msra.mxu0 %v3019_v27  ;;  %421 = vmatprep.mubr.f32.mxu0 %v2882_v1 }
  0x75   :  { %2307 = vmatprep.subr.bf16.mxu0 %v3022_v36 }
  0x76   :  { %2321 = vmatpush1.bf16.msra.mxu1 %v3019_v27 }
  0x77   :  { %2323 = vmatprep.subr.bf16.mxu1 %v3022_v36 }
  0x78   :  { %2309 = vmatpush1.bf16.msra.mxu0 %v3025_v40 }
  0x79   :  { %2311 = vmatprep.subr.bf16.mxu0 %v3028_v45 }
  0x7a   :  { %2325 = vmatpush1.bf16.msra.mxu1 %v3025_v40 }
  0x7b   :  { %2327 = vmatprep.subr.bf16.mxu1 %v3028_v45 }
  0x7c   :  { %2313 = vmatpush1.bf16.msra.mxu0 %v3031_v49 }
  0x7d   :  { %2331 = vmatprep.subr.bf16.mxu0 %v3011_v10 }
  0x7e   :  { %2329 = vmatpush1.bf16.msra.mxu1 %v3031_v49 }
  0x7f   :  { %2347 = vmatprep.subr.bf16.mxu1 %v3011_v10 }
 0x142   :  { %v205_v56 = vpop.f32.mrb[0].mxu0 }
 0x143   :  { %v207_v57 = vpop.f32.mrb[1].mxu0  ;;  %v3078_v2 = vadd.f32 %v205_v56, %v3075_v0 }
 0x144   :  { %v317_v58 = vpop.f32.mrb[0].mxu1  ;;  %v3068_v59 = vadd.f32 %v207_v57, %v3065_v55 }
 0x145   :  { %v319_v60 = vpop.f32.mrb[1].mxu1  ;;  %v322_v3 = vadd.f32 %v317_v58, %v3078_v2 }
 0x146   :  { %v323_v61 = vadd.f32 %v319_v60, %v3068_v59  ;;  %v3085_v18 = vpop.f32.mrb[2].mxu0 }
 0x147   :  { %v2216_v4 = vmul.f32 -1.442695, %v322_v3  ;;  %v3087_v19 = vpop.f32.mrb[3].mxu0 }
 0x148   :  { %2565 = vtanh.f32 %v323_v61  ;;  %v2217_v17 = vmul.f32 -1.442695, %v323_v61 }
 0x149   :  { %2567 = vpow2.f32 %v2216_v4 }
 0x152   :  { %v2566_v62 = vpop.eup %2565 }
 0x153   :  { %339 = vrot.lane.b32.xlu0 %v2566_v62, %s2883_s21  ;;  %v2568_v5 = vpop.eup %2567 }
 0x154   :  { %v330_v6 = vadd.f32 1.0, %v2568_v5 }
 0x156   :  { %2569 = vrcp.f32 %v330_v6 }
 0x160   :  { %v2570_v7 = vpop.eup %2569 }
 0x161   :  { %v337_v12 = vmul.f32 0.0, %v2570_v7 }
 0x1c5   :  { %v340_v8 = vpop.permute.xlu0 %339 }
 0x1c6   :  { %v342_v9 = vmul.f32 %v2570_v7, %v340_v8 }
 0x1c8   :  { %344 = vrot.lane.b32.xlu0 %v342_v9, %s2883_s21 }
 0x23a   :  { %v345_v13 = vpop.permute.xlu0 %344 }
 0x23b   :  { %v347_v15 = vadd.f32 %v345_v13, %v337_v12 }
 0x23d   :  { %2571 = vtanh.f32 %v347_v15  ;;  %v450_v42 = vrot.slane %v347_v15, 6 }
 0x23e   :  { %2573 = vpow2.f32 %v2217_v17 }
 0x247   :  { %v2572_v16 = vpop.eup %2571 }
 0x248   :  { %350 = vrot.lane.b32.xlu1 %v2572_v16, %s2883_s21  ;;  %v2574_v20 = vpop.eup %2573 }
 0x249   :  { %v331_v21 = vadd.f32 1.0, %v2574_v20 }
 0x24b   :  { %2575 = vrcp.f32 %v331_v21 }
 0x255   :  { %v2576_v22 = vpop.eup %2575 }
 0x2ba   :  { %v351_v24 = vpop.permute.xlu1 %350 }
 0x2bb   :  { %v3089_v25 = vmul.f32 %v2576_v22, %v351_v24 }
 0x2bd   :  { %2218 = vmatmul.mubr.msk.f32.vlgmr.msra.gmra.mrb[4].mxu0 %vm132_vm0, %v3089_v25 }
 0x2be   :  { %2333 = vmatpush1.bf16.msra.mxu0 %v3013_v14  ;;  %653 = vmatprep.mubr.f32.mxu0 %v2882_v1 }
 0x2bf   :  { %2335 = vmatprep.subr.bf16.mxu0 %v3017_v23 }
 0x2c2   :  { %2337 = vmatpush1.bf16.msra.mxu0 %v3019_v27 }
 0x2c3   :  { %2339 = vmatprep.subr.bf16.mxu0 %v3022_v36 }
 0x2c6   :  { %2341 = vmatpush1.bf16.msra.mxu0 %v3025_v40 }
 0x2c7   :  { %2343 = vmatprep.subr.bf16.mxu0 %v3028_v45 }
 0x2ca   :  { %2345 = vmatpush1.bf16.msra.mxu0 %v3031_v49 }
 0x2cb   :  { %2363 = vmatprep.subr.bf16.mxu0 %v3011_v10 }
 0x390   :  { %v423_v26 = vpop.f32.mrb[4].mxu0 }
 0x391   :  { %v425_v28 = vpop.f32.mrb[5].mxu0  ;;  %v430_v32 = vrot.slane %v423_v26, 6 }
 0x392   :  { %v431_v29 = vrot.slane %v425_v28, 6 }
 0x393   :  { %v434_v33 = vadd.f32 %v430_v32, %v3078_v2 }
 0x394   :  { %v435_v30 = vadd.f32 %v431_v29, %v3068_v59 }
 0x395   :  { %v2219_v34 = vmul.f32 -1.442695, %v434_v33 }
 0x396   :  { %2577 = vtanh.f32 %v435_v30  ;;  %v2220_v48 = vmul.f32 -1.442695, %v435_v30 }
 0x397   :  { %2579 = vpow2.f32 %v2219_v34 }
 0x3a0   :  { %v2578_v31 = vpop.eup %2577 }
 0x3a1   :  { %454 = vrot.lane.b32.xlu1 %v2578_v31, %s2883_s21  ;;  %v2580_v35 = vpop.eup %2579 }
 0x3a2   :  { %v442_v37 = vadd.f32 1.0, %v2580_v35 }
 0x3a4   :  { %2581 = vrcp.f32 %v442_v37 }
 0x3ae   :  { %v2582_v38 = vpop.eup %2581 }
 0x3af   :  { %v452_v43 = vmul.f32 %v2582_v38, %v450_v42 }
 0x413   :  { %v455_v39 = vpop.permute.xlu1 %454 }
 0x414   :  { %v457_v41 = vmul.f32 %v2582_v38, %v455_v39 }
 0x416   :  { %459 = vrot.lane.b32.xlu0 %v457_v41, %s2883_s21 }
 0x488   :  { %v460_v44 = vpop.permute.xlu0 %459 }
 0x489   :  { %v462_v46 = vadd.f32 %v460_v44, %v452_v43 }
 0x48b   :  { %2583 = vtanh.f32 %v462_v46  ;;  %v566_v15 = vrot.slane %v462_v46, 6 }
 0x48c   :  { %2585 = vpow2.f32 %v2220_v48 }
 0x495   :  { %v2584_v47 = vpop.eup %2583 }
 0x496   :  { %465 = vrot.lane.b32.xlu1 %v2584_v47, %s2883_s21  ;;  %v2586_v50 = vpop.eup %2585 }
 0x497   :  { %v443_v51 = vadd.f32 1.0, %v2586_v50 }
 0x499   :  { %2587 = vrcp.f32 %v443_v51 }
 0x4a3   :  { %v2588_v54 = vpop.eup %2587 }
 0x508   :  { %v466_v56 = vpop.permute.xlu1 %465 }
 0x509   :  { %v468_v57 = vmul.f32 %v2588_v54, %v466_v56 }
 0x50b   :  { %v470_v58 = vrot.slane %v468_v57, 2  ;;  %v1159_v31 = vsel %vm1158_vm1, %v3089_v25, %v468_v57 }
 0x50d   :  { %2221 = vmatmul.mubr.msk.f32.vlgmr.msra.gmra.mrb[2].mxu1 %vm132_vm0, %v470_v58 }
 0x50e   :  { %2349 = vmatpush1.bf16.msra.mxu1 %v3013_v14  ;;  %769 = vmatprep.mubr.f32.mxu1 %v2882_v1 }
 0x50f   :  { %2351 = vmatprep.subr.bf16.mxu1 %v3017_v23 }
 0x512   :  { %2353 = vmatpush1.bf16.msra.mxu1 %v3019_v27 }
 0x513   :  { %2355 = vmatprep.subr.bf16.mxu1 %v3022_v36 }
 0x516   :  { %2357 = vmatpush1.bf16.msra.mxu1 %v3025_v40 }
 0x517   :  { %2359 = vmatprep.subr.bf16.mxu1 %v3028_v45 }
 0x51a   :  { %2361 = vmatpush1.bf16.msra.mxu1 %v3031_v49 }
 0x51b   :  { %2379 = vmatprep.subr.bf16.mxu1 %v3011_v10 }
 0x5e0   :  { %v539_v60 = vpop.f32.mrb[2].mxu1 }
 0x5e1   :  { %v541_v61 = vpop.f32.mrb[3].mxu1  ;;  %v546_v5 = vrot.slane %v539_v60, 4 }
 0x5e2   :  { %v547_v62 = vrot.slane %v541_v61, 4 }
 0x5e3   :  { %v550_v6 = vadd.f32 %v546_v5, %v3078_v2 }
 0x5e4   :  { %v551_v3 = vadd.f32 %v547_v62, %v3068_v59 }
 0x5e5   :  { %v2222_v7 = vmul.f32 -1.442695, %v550_v6 }
 0x5e6   :  { %2589 = vtanh.f32 %v551_v3  ;;  %v2223_v22 = vmul.f32 -1.442695, %v551_v3 }
 0x5e7   :  { %2591 = vpow2.f32 %v2222_v7 }
 0x5f0   :  { %v2590_v4 = vpop.eup %2589 }
 0x5f1   :  { %570 = vrot.lane.b32.xlu0 %v2590_v4, %s2883_s21  ;;  %v2592_v8 = vpop.eup %2591  ;;  %v3154_v4 = vadd.f32 %v3087_v19, %v3065_v55 }
 0x5f2   :  { %v558_v9 = vadd.f32 1.0, %v2592_v8 }
 0x5f4   :  { %2593 = vrcp.f32 %v558_v9  ;;  %v3160_v9 = vadd.f32 %v3085_v18, %v3075_v0 }
 0x5fe   :  { %v2594_v11 = vpop.eup %2593 }
 0x5ff   :  { %v568_v16 = vmul.f32 %v2594_v11, %v566_v15 }
 0x663   :  { %v571_v12 = vpop.permute.xlu0 %570 }
 0x664   :  { %v573_v13 = vmul.f32 %v2594_v11, %v571_v12 }
 0x666   :  { %575 = vrot.lane.b32.xlu1 %v573_v13, %s2883_s21 }
 0x6d8   :  { %v576_v17 = vpop.permute.xlu1 %575 }
 0x6d9   :  { %v578_v20 = vadd.f32 %v576_v17, %v568_v16 }
 0x6db   :  { %2595 = vtanh.f32 %v578_v20  ;;  %v682_v48 = vrot.slane %v578_v20, 6 }
 0x6dc   :  { %2597 = vpow2.f32 %v2223_v22 }
 0x6e5   :  { %v2596_v21 = vpop.eup %2595 }
 0x6e6   :  { %581 = vrot.lane.b32.xlu0 %v2596_v21, %s2883_s21  ;;  %v2598_v24 = vpop.eup %2597 }
 0x6e7   :  { %v559_v26 = vadd.f32 1.0, %v2598_v24 }
 0x6e9   :  { %2599 = vrcp.f32 %v559_v26 }
 0x6f3   :  { %v2600_v28 = vpop.eup %2599 }
 0x758   :  { %v582_v29 = vpop.permute.xlu0 %581 }
 0x759   :  { %v584_v30 = vmul.f32 %v2600_v28, %v582_v29 }
 0x75b   :  { %v586_v32 = vrot.slane %v584_v30, 4  ;;  %v1161_v33 = vsel %vm1160_vm2, %v1159_v31, %v584_v30 }
 0x75d   :  { %2224 = vmatmul.mubr.msk.f32.vlgmr.msra.gmra.mrb[6].mxu0 %vm132_vm0, %v586_v32 }
 0x75e   :  { %2365 = vmatpush1.bf16.msra.mxu0 %v3013_v14  ;;  %878 = vmatprep.mubr.f32.mxu0 %v2882_v1 }
 0x75f   :  { %2367 = vmatprep.subr.bf16.mxu0 %v3017_v23 }
 0x762   :  { %2369 = vmatpush1.bf16.msra.mxu0 %v3019_v27 }
 0x763   :  { %2371 = vmatprep.subr.bf16.mxu0 %v3022_v36 }
 0x766   :  { %2373 = vmatpush1.bf16.msra.mxu0 %v3025_v40 }
 0x767   :  { %2375 = vmatprep.subr.bf16.mxu0 %v3028_v45 }
 0x76a   :  { %2377 = vmatpush1.bf16.msra.mxu0 %v3031_v49 }
 0x76b   :  { %2395 = vmatprep.subr.bf16.mxu0 %v3011_v10 }
 0x830   :  { %v655_v25 = vpop.f32.mrb[6].mxu0 }
 0x831   :  { %v657_v34 = vpop.f32.mrb[7].mxu0  ;;  %v662_v39 = vrot.slane %v655_v25, 2 }
 0x832   :  { %v663_v35 = vrot.slane %v657_v34, 2 }
 0x833   :  { %v666_v41 = vadd.f32 %v662_v39, %v3078_v2 }
 0x834   :  { %v667_v37 = vadd.f32 %v663_v35, %v3068_v59 }
 0x835   :  { %v2225_v42 = vmul.f32 -1.442695, %v666_v41 }
 0x836   :  { %2601 = vtanh.f32 %v667_v37  ;;  %v2226_v56 = vmul.f32 -1.442695, %v667_v37 }
 0x837   :  { %2603 = vpow2.f32 %v2225_v42  ;;  %v1168_v42 = vld [vmem:[#allocation8 + $0x8] sm:$0xff] }
 0x840   :  { %v2602_v38 = vpop.eup %2601 }
 0x841   :  { %686 = vrot.lane.b32.xlu1 %v2602_v38, %s2883_s21  ;;  %v2604_v43 = vpop.eup %2603 }
 0x842   :  { %v674_v44 = vadd.f32 1.0, %v2604_v43  ;;  %v1170_v43 = vld [vmem:[#allocation8 + $0x18] sm:$0xff] }
 0x844   :  { %2605 = vrcp.f32 %v674_v44  ;;  %v2410_v44 = vpack.c.bf16 %v1170_v43, %v1168_v42  ;;  %v237_v43 = vld [vmem:[#allocation10 + $0x28] sm:$0xff] }
 0x84e   :  { %v2606_v46 = vpop.eup %2605 }
 0x84f   :  { %v684_v50 = vmul.f32 %v2606_v46, %v682_v48 }
 0x8b3   :  { %v687_v47 = vpop.permute.xlu1 %686 }
 0x8b4   :  { %v689_v10 = vmul.f32 %v2606_v46, %v687_v47 }
 0x8b6   :  { %691 = vrot.lane.b32.xlu0 %v689_v10, %s2883_s21 }
 0x928   :  { %v692_v59 = vpop.permute.xlu0 %691 }
 0x929   :  { %v694_v51 = vadd.f32 %v692_v59, %v684_v50  ;;  %v1167_v50 = vld [vmem:[#allocation8] sm:$0xff]  ;;  %v1169_v59 = vld [vmem:[#allocation8 + $0x10] sm:$0xff] }
 0x92b   :  { %2607 = vtanh.f32 %v694_v51  ;;  %v792_v17 = vrot.slane %v694_v51, 6 }
 0x92c   :  { %2609 = vpow2.f32 %v2226_v56  ;;  %v1172_v56 = vld [vmem:[#allocation8 + $0x28] sm:$0xff] }
 0x935   :  { %v2608_v54 = vpop.eup %2607 }
 0x936   :  { %697 = vrot.lane.b32.xlu1 %v2608_v54, %s2883_s21  ;;  %v2610_v2 = vpop.eup %2609 }
 0x937   :  { %v675_v57 = vadd.f32 1.0, %v2610_v2  ;;  %v1174_v2 = vld [vmem:[#allocation8 + $0x38] sm:$0xff] }
 0x939   :  { %2611 = vrcp.f32 %v675_v57 }
 0x943   :  { %v2612_v58 = vpop.eup %2611 }
 0x9a8   :  { %v698_v60 = vpop.permute.xlu1 %697 }
 0x9a9   :  { %v700_v61 = vmul.f32 %v2612_v58, %v698_v60  ;;  %v2412_v58 = vpack.c.bf16 %v1169_v59, %v1167_v50  ;;  %v243_v50 = vld [vmem:[#allocation10 + $0x58] sm:$0xff] }
 0x9ab   :  { %v702_v62 = vrot.slane %v700_v61, 6  ;;  %v3141_v3 = vsel %vm1162_vm3, %v1161_v33, %v700_v61  ;;  %v2414_v61 = vpack.c.bf16 %v1174_v2, %v1172_v56 }
 0x9ad   :  { %2227 = vmatmul.mubr.msk.f32.vlgmr.msra.gmra.mrb[4].mxu1 %vm132_vm0, %v702_v62  ;;  %v1171_v62 = vld [vmem:[#allocation8 + $0x20] sm:$0xff] }
 0x9ae   :  { %2381 = vmatpush1.bf16.msra.mxu1 %v3013_v14  ;;  %994 = vmatprep.mubr.f32.mxu1 %v2882_v1 }
 0x9af   :  { %2383 = vmatprep.subr.bf16.mxu1 %v3017_v23 }
 0x9b2   :  { %2385 = vmatpush1.bf16.msra.mxu1 %v3019_v27 }
 0x9b3   :  { %2387 = vmatprep.subr.bf16.mxu1 %v3022_v36 }
 0x9b6   :  { %2389 = vmatpush1.bf16.msra.mxu1 %v3025_v40 }
 0x9b7   :  { %2391 = vmatprep.subr.bf16.mxu1 %v3028_v45 }
 0x9ba   :  { %2393 = vmatpush1.bf16.msra.mxu1 %v3031_v49 }
 0x9bb   :  { %2411 = vmatprep.subr.bf16.mxu1 %v2410_v44 }
 0xa80   :  { %v771_v5 = vpop.f32.mrb[4].mxu1 }
 0xa81   :  { %v773_v6 = vpop.f32.mrb[5].mxu1  ;;  %v776_v11 = vadd.f32 %v771_v5, %v3160_v9  ;;  %v1173_v5 = vld [vmem:[#allocation8 + $0x30] sm:$0xff] }
 0xa82   :  { %v777_v7 = vadd.f32 %v773_v6, %v3154_v4  ;;  %v1176_v6 = vld [vmem:[#allocation8 + $0x48] sm:$0xff] }
 0xa83   :  { %v2228_v12 = vmul.f32 -1.442695, %v776_v11 }
 0xa84   :  { %2613 = vtanh.f32 %v777_v7  ;;  %v2229_v0 = vmul.f32 -1.442695, %v777_v7  ;;  %v1178_v7 = vld [vmem:[#allocation8 + $0x58] sm:$0xff] }
 0xa85   :  { %2615 = vpow2.f32 %v2228_v12  ;;  %v2418_v11 = vpack.c.bf16 %v1178_v7, %v1176_v6  ;;  %v1175_v12 = vld [vmem:[#allocation8 + $0x40] sm:$0xff] }
 0xa8e   :  { %v2614_v8 = vpop.eup %2613 }
 0xa8f   :  { %796 = vrot.lane.b32.xlu0 %v2614_v8, %s2883_s21  ;;  %v2616_v13 = vpop.eup %2615  ;;  %v2416_v8 = vpack.c.bf16 %v1173_v5, %v1171_v62  ;;  %v244_v62 = vld [vmem:[#allocation10 + $0x60] sm:$0xff]  ;;  %v246_v5 = vld [vmem:[#allocation10 + $0x70] sm:$0xff] }
 0xa90   :  { %v784_v15 = vadd.f32 1.0, %v2616_v13  ;;  %v1177_v13 = vld [vmem:[#allocation8 + $0x50] sm:$0xff]  ;;  %v3227_v6 = vpack.c.bf16 %v246_v5, %v244_v62 }
 0xa92   :  { %2617 = vrcp.f32 %v784_v15  ;;  %v1180_v15 = vld [vmem:[#allocation8 + $0x68] sm:$0xff] }
 0xa9c   :  { %v2618_v55 = vpop.eup %2617 }
 0xa9d   :  { %v794_v20 = vmul.f32 %v2618_v55, %v792_v17  ;;  %v1179_v17 = vld [vmem:[#allocation8 + $0x60] sm:$0xff] }
 0xb01   :  { %v797_v19 = vpop.permute.xlu0 %796 }
 0xb02   :  { %v799_v16 = vmul.f32 %v2618_v55, %v797_v19  ;;  %v1182_v55 = vld [vmem:[#allocation8 + $0x78] sm:$0xff]  ;;  %v2420_v19 = vpack.c.bf16 %v1177_v13, %v1175_v12 }
 0xb04   :  { %801 = vrot.lane.b32.xlu1 %v799_v16, %s2883_s21  ;;  %v2422_v16 = vpack.c.bf16 %v1182_v55, %v1180_v15 }
 0xb76   :  { %v802_v21 = vpop.permute.xlu1 %801 }
 0xb77   :  { %v804_v22 = vadd.f32 %v802_v21, %v794_v20  ;;  %v1181_v20 = vld [vmem:[#allocation8 + $0x70] sm:$0xff] }
 0xb78   :  { %v2424_v21 = vpack.c.bf16 %v1181_v20, %v1179_v17 }
 0xb79   :  { %2619 = vtanh.f32 %v804_v22  ;;  %v907_v37 = vrot.slane %v804_v22, 6 }
 0xb7a   :  { %2621 = vpow2.f32 %v2229_v0 }
 0xb83   :  { %v2620_v24 = vpop.eup %2619 }
 0xb84   :  { %807 = vrot.lane.b32.xlu0 %v2620_v24, %s2883_s21  ;;  %v2622_v18 = vpop.eup %2621 }
 0xb85   :  { %v785_v26 = vadd.f32 1.0, %v2622_v18 }
 0xb87   :  { %2623 = vrcp.f32 %v785_v26 }
 0xb91   :  { %v2624_v28 = vpop.eup %2623 }
 0xbf6   :  { %v808_v29 = vpop.permute.xlu0 %807 }
 0xbf7   :  { %v3165_v30 = vmul.f32 %v2624_v28, %v808_v29 }
 0xbf9   :  { %2230 = vmatmul.mubr.msk.f32.vlgmr.msra.gmra.mrb[8].mxu0 %vm132_vm0, %v3165_v30 }
 0xbfa   :  { %2397 = vmatpush1.bf16.msra.mxu0 %v3013_v14  ;;  %1110 = vmatprep.mubr.f32.mxu0 %v2882_v1 }
 0xbfb   :  { %2399 = vmatprep.subr.bf16.mxu0 %v3017_v23 }
 0xbfe   :  { %2401 = vmatpush1.bf16.msra.mxu0 %v3019_v27 }
 0xbff   :  { %2403 = vmatprep.subr.bf16.mxu0 %v3022_v36 }
 0xc02   :  { %2405 = vmatpush1.bf16.msra.mxu0 %v3025_v40 }
 0xc03   :  { %2407 = vmatprep.subr.bf16.mxu0 %v3028_v45 }
 0xc06   :  { %2409 = vmatpush1.bf16.msra.mxu0 %v3031_v49 }
 0xccc   :  { %v880_v31 = vpop.f32.mrb[8].mxu0 }
 0xccd   :  { %v882_v32 = vpop.f32.mrb[9].mxu0  ;;  %v887_v23 = vrot.slane %v880_v31, 6 }
 0xcce   :  { %v888_v33 = vrot.slane %v882_v32, 6 }
 0xccf   :  { %v891_v27 = vadd.f32 %v887_v23, %v3160_v9 }
 0xcd0   :  { %v892_v25 = vadd.f32 %v888_v33, %v3154_v4 }
 0xcd1   :  { %v2231_v34 = vmul.f32 -1.442695, %v891_v27 }
 0xcd2   :  { %2625 = vtanh.f32 %v892_v25  ;;  %v2232_v47 = vmul.f32 -1.442695, %v892_v25 }
 0xcd3   :  { %2627 = vpow2.f32 %v2231_v34 }
 0xcdc   :  { %v2626_v14 = vpop.eup %2625 }
 0xcdd   :  { %911 = vrot.lane.b32.xlu1 %v2626_v14, %s2883_s21  ;;  %v2628_v36 = vpop.eup %2627 }
 0xcde   :  { %v899_v40 = vadd.f32 1.0, %v2628_v36 }
 0xce0   :  { %2629 = vrcp.f32 %v899_v40 }
 0xcea   :  { %v2630_v45 = vpop.eup %2629 }
 0xceb   :  { %v909_v38 = vmul.f32 %v2630_v45, %v907_v37 }
 0xd4f   :  { %v912_v35 = vpop.permute.xlu1 %911 }
 0xd50   :  { %v914_v49 = vmul.f32 %v2630_v45, %v912_v35  ;;  %v233_v35 = vld [vmem:[#allocation10 + $0x8] sm:$0xff] }
 0xd52   :  { %916 = vrot.lane.b32.xlu0 %v914_v49, %s2883_s21  ;;  %v235_v49 = vld [vmem:[#allocation10 + $0x18] sm:$0xff] }
 0xd53   :  { %v3205_v37 = vpack.c.bf16 %v235_v49, %v233_v35 }
 0xd55   :  { %2427 = vmatprep.subr.bf16.mxu0 %v3205_v37 }
 0xdc4   :  { %v917_v39 = vpop.permute.xlu0 %916 }
 0xdc5   :  { %v3181_v41 = vadd.f32 %v917_v39, %v909_v38  ;;  %v232_v38 = vld [vmem:[#allocation10] sm:$0xff]  ;;  %v234_v39 = vld [vmem:[#allocation10 + $0x10] sm:$0xff] }
 0xdc6   :  { %v3207_v42 = vpack.c.bf16 %v234_v39, %v232_v38 }
 0xdc7   :  { %2631 = vtanh.f32 %v3181_v41  ;;  %v1023_v34 = vrot.slane %v3181_v41, 6  ;;  %v239_v41 = vld [vmem:[#allocation10 + $0x38] sm:$0xff] }
 0xdc8   :  { %2633 = vpow2.f32 %v2232_v47  ;;  %v3212_v44 = vpack.c.bf16 %v239_v41, %v237_v43  ;;  %v238_v47 = vld [vmem:[#allocation10 + $0x30] sm:$0xff] }
 0xdd1   :  { %v2632_v46 = vpop.eup %2631 }
 0xdd2   :  { %922 = vrot.lane.b32.xlu1 %v2632_v46, %s2883_s21  ;;  %v2634_v10 = vpop.eup %2633  ;;  %v236_v46 = vld [vmem:[#allocation10 + $0x20] sm:$0xff] }
 0xdd3   :  { %v900_v48 = vadd.f32 1.0, %v2634_v10  ;;  %v3214_v10 = vpack.c.bf16 %v238_v47, %v236_v46 }
 0xdd5   :  { %2635 = vrcp.f32 %v900_v48  ;;  %v241_v48 = vld [vmem:[#allocation10 + $0x48] sm:$0xff] }
 0xdd6   :  { %v3218_v59 = vpack.c.bf16 %v243_v50, %v241_v48 }
 0xddf   :  { %v2636_v51 = vpop.eup %2635 }
 0xe44   :  { %v923_v54 = vpop.permute.xlu1 %922 }
 0xe45   :  { %v3185_v57 = vmul.f32 %v2636_v51, %v923_v54  ;;  %v240_v51 = vld [vmem:[#allocation10 + $0x40] sm:$0xff]  ;;  %v242_v54 = vld [vmem:[#allocation10 + $0x50] sm:$0xff] }
 0xe46   :  { %v3220_v56 = vpack.c.bf16 %v242_v54, %v240_v51 }
 0xe47   :  { %v927_v60 = vrot.slane %v3185_v57, 2  ;;  %v1164_v55 = vsel %vm1158_vm1, %v3165_v30, %v3185_v57 }
 0xe49   :  { %2233 = vmatmul.mubr.msk.f32.vlgmr.msra.gmra.mrb[6].mxu1 %vm132_vm0, %v927_v60  ;;  %v247_v60 = vld [vmem:[#allocation10 + $0x78] sm:$0xff] }
 0xe4a   :  { %2413 = vmatpush1.bf16.msra.mxu1 %v2412_v58  ;;  %1265 = vmatprep.mubr.f32.mxu1 %v2882_v1  ;;  %v245_v58 = vld [vmem:[#allocation10 + $0x68] sm:$0xff] }
 0xe4b   :  { %2415 = vmatprep.subr.bf16.mxu1 %v2414_v61  ;;  %v3225_v61 = vpack.c.bf16 %v247_v60, %v245_v58 }
 0xe4e   :  { %2417 = vmatpush1.bf16.msra.mxu1 %v2416_v8 }
 0xe4f   :  { %2419 = vmatprep.subr.bf16.mxu1 %v2418_v11 }
 0xe52   :  { %2421 = vmatpush1.bf16.msra.mxu1 %v2420_v19 }
 0xe53   :  { %2423 = vmatprep.subr.bf16.mxu1 %v2422_v16 }
 0xe56   :  { %2425 = vmatpush1.bf16.msra.mxu1 %v2424_v21  ;;  %v1183_v21 = vld [vmem:[%s3401_s6] sm:$0x3] }
 0xe57   :  { %2443 = vmatprep.subr.bf16.mxu1 %v3205_v37 }
 0xe59   :  { %2239 = vmatmul.mubr.msk.f32.vlgmr.msra.gmra.mrb[8].mxu1 %vm132_vm0, %v3141_v3 }
 0xe5a   :  { %1271 = vmatprep.mubr.f32.mxu1 %v2882_v1  ;;  %2445 = vmatpush1.bf16.msra.mxu1 %v3207_v42 }
 0xe5b   :  { %2447 = vmatprep.subr.bf16.mxu1 %v3212_v44 }
 0xe5e   :  { %2449 = vmatpush1.bf16.msra.mxu1 %v3214_v10 }
 0xe5f   :  { %2451 = vmatprep.subr.bf16.mxu1 %v3218_v59 }
 0xe62   :  { %2453 = vmatpush1.bf16.msra.mxu1 %v3220_v56 }
 0xe63   :  { %2455 = vmatprep.subr.bf16.mxu1 %v3225_v61 }
 0xe66   :  { %2457 = vmatpush1.bf16.msra.mxu1 %v3227_v6 }
 0xe67   :  { %2475 = vmatprep.subr.bf16.mxu1 %v3205_v37 }
 0xf1c   :  { %v996_v22 = vpop.f32.mrb[6].mxu1 }
 0xf1d   :  { %v998_v24 = vpop.f32.mrb[7].mxu1  ;;  %v1003_v31 = vrot.slane %v996_v22, 4  ;;  %v3264_v22 = vrot.slane %v1183_v21, %v128_v53 }
 0xf1e   :  { %v1004_v0 = vrot.slane %v998_v24, 4 }
 0xf1f   :  { %v1007_v32 = vadd.f32 %v1003_v31, %v3160_v9 }
 0xf20   :  { %v1008_v18 = vadd.f32 %v1004_v0, %v3154_v4 }
 0xf21   :  { %v2234_v33 = vmul.f32 -1.442695, %v1007_v32 }
 0xf22   :  { %2637 = vtanh.f32 %v1008_v18  ;;  %v2235_v7 = vmul.f32 -1.442695, %v1008_v18 }
 0xf23   :  { %2639 = vpow2.f32 %v2234_v33 }
 0xf2c   :  { %v2638_v26 = vpop.eup %2637  ;;  %v3194_v28 = vpop.f32.mrb[8].mxu1 }
 0xf2d   :  { %v3196_v29 = vpop.f32.mrb[9].mxu1  ;;  %1027 = vrot.lane.b32.xlu0 %v2638_v26, %s2883_s21  ;;  %v2640_v3 = vpop.eup %2639 }
 0xf2e   :  { %v1015_v25 = vadd.f32 1.0, %v2640_v3  ;;  %v3269_v26 = vadd.f32 %v3196_v29, %v3264_v22  ;;  %v3276_v3 = vrot.slane %v1183_v21, %v124_v63 }
 0xf30   :  { %2641 = vrcp.f32 %v1015_v25  ;;  %v3280_v25 = vadd.f32 %v3194_v28, %v3276_v3 }
 0xf3a   :  { %v2642_v14 = vpop.eup %2641 }
 0xf3b   :  { %v1025_v36 = vmul.f32 %v2642_v14, %v1023_v34 }
 0xf9f   :  { %v1028_v23 = vpop.permute.xlu0 %1027 }
 0xfa0   :  { %v1030_v27 = vmul.f32 %v2642_v14, %v1028_v23 }
 0xfa2   :  { %1032 = vrot.lane.b32.xlu1 %v1030_v27, %s2883_s21 }
0x1014   :  { %v1033_v40 = vpop.permute.xlu1 %1032 }
0x1015   :  { %v3202_v45 = vadd.f32 %v1033_v40, %v1025_v36 }
0x1017   :  { %2643 = vtanh.f32 %v3202_v45  ;;  %v1139_v28 = vrot.slane %v3202_v45, 6 }
0x1018   :  { %2645 = vpow2.f32 %v2235_v7 }
0x1021   :  { %v2644_v2 = vpop.eup %2643 }
0x1022   :  { %1038 = vrot.lane.b32.xlu0 %v2644_v2, %s2883_s21  ;;  %v2646_v8 = vpop.eup %2645 }
0x1023   :  { %v1016_v11 = vadd.f32 1.0, %v2646_v8 }
0x1025   :  { %2647 = vrcp.f32 %v1016_v11 }
0x102f   :  { %v2648_v12 = vpop.eup %2647 }
0x1094   :  { %v1039_v13 = vpop.permute.xlu0 %1038 }
0x1095   :  { %v1041_v15 = vmul.f32 %v2648_v12, %v1039_v13 }
0x1097   :  { %v1043_v19 = vrot.slane %v1041_v15, 4  ;;  %v3236_v16 = vsel %vm1160_vm2, %v1164_v55, %v1041_v15 }
0x1099   :  { %2236 = vmatmul.mubr.msk.f32.vlgmr.msra.gmra.mrb[10].mxu0 %vm132_vm0, %v1043_v19 }
0x109a   :  { %2429 = vmatpush1.bf16.msra.mxu0 %v3207_v42  ;;  %1342 = vmatprep.mubr.f32.mxu0 %v2882_v1 }
0x109b   :  { %2431 = vmatprep.subr.bf16.mxu0 %v3212_v44 }
0x109e   :  { %2433 = vmatpush1.bf16.msra.mxu0 %v3214_v10 }
0x109f   :  { %2435 = vmatprep.subr.bf16.mxu0 %v3218_v59 }
0x10a2   :  { %2437 = vmatpush1.bf16.msra.mxu0 %v3220_v56 }
0x10a3   :  { %2439 = vmatprep.subr.bf16.mxu0 %v3225_v61 }
0x10a6   :  { %2441 = vmatpush1.bf16.msra.mxu0 %v3227_v6 }
0x10a7   :  { %2459 = vmatprep.subr.bf16.mxu0 %v3205_v37 }
0x10a9   :  { %1343 = vmatmul.mubr.f32.vlgmr.msra.gmra.mrb[12].mxu0 %v2882_v1 }
0x10aa   :  { %2461 = vmatpush1.bf16.msra.mxu0 %v3207_v42  ;;  %1564 = vmatprep.mubr.f32.mxu0 %v2882_v1 }
0x10ab   :  { %2463 = vmatprep.subr.bf16.mxu0 %v3212_v44 }
0x10ae   :  { %2465 = vmatpush1.bf16.msra.mxu0 %v3214_v10 }
0x10af   :  { %2467 = vmatprep.subr.bf16.mxu0 %v3218_v59 }
0x10b2   :  { %2469 = vmatpush1.bf16.msra.mxu0 %v3220_v56 }
0x10b3   :  { %2471 = vmatprep.subr.bf16.mxu0 %v3225_v61 }
0x10b6   :  { %2473 = vmatpush1.bf16.msra.mxu0 %v3227_v6 }
0x10b7   :  { %2491 = vmatprep.subr.bf16.mxu0 %v3205_v37 }
0x116c   :  { %v1112_v30 = vpop.f32.mrb[10].mxu0 }
0x116d   :  { %v1114_v57 = vpop.f32.mrb[11].mxu0  ;;  %v1119_v32 = vrot.slane %v1112_v30, 2 }
0x116e   :  { %v1120_v17 = vrot.slane %v1114_v57, 2 }
0x116f   :  { %v1123_v33 = vadd.f32 %v1119_v32, %v3160_v9 }
0x1170   :  { %v1124_v20 = vadd.f32 %v1120_v17, %v3154_v4 }
0x1171   :  { %v2237_v53 = vmul.f32 -1.442695, %v1123_v33 }
0x1172   :  { %2649 = vtanh.f32 %v1124_v20  ;;  %v2238_v51 = vmul.f32 -1.442695, %v1124_v20 }
0x117c   :  { %v2650_v24 = vpop.eup %2649  ;;  %v1344_v0 = vpop.f32.mrb[12].mxu0 }
0x117d   :  { %v1346_v18 = vpop.f32.mrb[13].mxu0  ;;  %1143 = vrot.lane.b32.xlu1 %v2650_v24, %s2883_s21  ;;  %v1349_v14 = vadd.f32 %v1344_v0, %v3280_v25 }
0x117e   :  { %v1350_v4 = vadd.f32 %v1346_v18, %v3269_v26 }
0x117f   :  { %v2241_v27 = vmul.f32 -1.442695, %v1349_v14 }
0x1180   :  { %2651 = vtanh.f32 %v1350_v4  ;;  %v2242_v58 = vmul.f32 -1.442695, %v1350_v4 }
0x1181   :  { %2653 = vpow2.f32 %v2237_v53 }
0x118a   :  { %v2652_v31 = vpop.eup %2651 }
0x118b   :  { %1366 = vrot.lane.b32.xlu0 %v2652_v31, %s2883_s21  ;;  %v2654_v29 = vpop.eup %2653 }
0x118c   :  { %v1131_v23 = vadd.f32 1.0, %v2654_v29 }
0x118e   :  { %2655 = vrcp.f32 %v1131_v23 }
0x118f   :  { %2657 = vpow2.f32 %v2241_v27 }
0x1198   :  { %v2656_v34 = vpop.eup %2655 }
0x1199   :  { %v2658_v9 = vpop.eup %2657  ;;  %v1141_v38 = vmul.f32 %v2656_v34, %v1139_v28 }
0x119a   :  { %v1357_v52 = vadd.f32 1.0, %v2658_v9 }
0x119c   :  { %2659 = vrcp.f32 %v1357_v52 }
0x11a6   :  { %v2660_v63 = vpop.eup %2659 }
0x11a7   :  { %v1364_v46 = vmul.f32 0.0, %v2660_v63 }
0x11ef   :  { %v1144_v36 = vpop.permute.xlu1 %1143 }
0x11f0   :  { %v1146_v40 = vmul.f32 %v2656_v34, %v1144_v36 }
0x11f2   :  { %1148 = vrot.lane.b32.xlu1 %v1146_v40, %s2883_s21 }
0x11fd   :  { %v1367_v35 = vpop.permute.xlu0 %1366 }
0x11fe   :  { %v1369_v49 = vmul.f32 %v2660_v63, %v1367_v35 }
0x1200   :  { %1371 = vrot.lane.b32.xlu0 %v1369_v49, %s2883_s21 }
0x1264   :  { %v1149_v39 = vpop.permute.xlu1 %1148 }
0x1265   :  { %v1151_v43 = vadd.f32 %v1149_v39, %v1141_v38 }
0x1267   :  { %2661 = vtanh.f32 %v1151_v43 }
0x1271   :  { %v2662_v41 = vpop.eup %2661 }
0x1272   :  { %1154 = vrot.lane.b32.xlu1 %v2662_v41, %s2883_s21  ;;  %v1372_v47 = vpop.permute.xlu0 %1371 }
0x1273   :  { %v1374_v48 = vadd.f32 %v1372_v47, %v1364_v46 }
0x1275   :  { %2663 = vtanh.f32 %v1374_v48  ;;  %v1477_v33 = vrot.slane %v1374_v48, 6 }
0x1276   :  { %2665 = vpow2.f32 %v2238_v51 }
0x127f   :  { %v2664_v50 = vpop.eup %2663 }
0x1280   :  { %1377 = vrot.lane.b32.xlu0 %v2664_v50, %s2883_s21  ;;  %v2666_v54 = vpop.eup %2665 }
0x1281   :  { %v1132_v2 = vadd.f32 1.0, %v2666_v54 }
0x1283   :  { %2667 = vrcp.f32 %v1132_v2 }
0x1284   :  { %2669 = vpow2.f32 %v2242_v58 }
0x128d   :  { %v2668_v45 = vpop.eup %2667 }
0x128e   :  { %v2670_v62 = vpop.eup %2669 }
0x128f   :  { %v1358_v8 = vadd.f32 1.0, %v2670_v62 }
0x1291   :  { %2671 = vrcp.f32 %v1358_v8 }
0x129b   :  { %v2672_v11 = vpop.eup %2671 }
0x12e4   :  { %v1155_v60 = vpop.permute.xlu1 %1154 }
0x12e5   :  { %v1157_v5 = vmul.f32 %v2668_v45, %v1155_v60 }
0x12e7   :  { %v1166_v7 = vsel %vm1162_vm3, %v3236_v16, %v1157_v5 }
0x12e8   :  { %2240 = vmatmul.mubr.msk.f32.gmra.mrb[10].mxu1 %vm132_vm0, %v1166_v7 }
0x12e9   :  { %1448 = vmatprep.mubr.f32.mxu1 %v2882_v1 }
0x12f2   :  { %v1378_v12 = vpop.permute.xlu0 %1377 }
0x12f3   :  { %v1380_v13 = vmul.f32 %v2672_v11, %v1378_v12 }
0x12f5   :  { %2243 = vmatmul.mubr.msk.f32.vlgmr.msra.gmra.mrb[12].mxu1 %vm132_vm0, %v1380_v13 }
0x12f6   :  { %2477 = vmatpush1.bf16.msra.mxu1 %v3207_v42  ;;  %1680 = vmatprep.mubr.f32.mxu1 %v2882_v1 }
0x12f7   :  { %2479 = vmatprep.subr.bf16.mxu1 %v3212_v44 }
0x12fa   :  { %2481 = vmatpush1.bf16.msra.mxu1 %v3214_v10 }
0x12fb   :  { %2483 = vmatprep.subr.bf16.mxu1 %v3218_v59 }
0x12fe   :  { %2485 = vmatpush1.bf16.msra.mxu1 %v3220_v56 }
0x12ff   :  { %2487 = vmatprep.subr.bf16.mxu1 %v3225_v61 }
0x1302   :  { %2489 = vmatpush1.bf16.msra.mxu1 %v3227_v6 }
0x1303   :  { %2507 = vmatprep.subr.bf16.mxu1 %v3205_v37 }
0x13bb   :  { %v3302_v15 = vpop.f32.mrb[10].mxu1 }
0x13bc   :  { %v3304_v55 = vpop.f32.mrb[11].mxu1 }
0x13c8   :  { %v1450_v19 = vpop.f32.mrb[12].mxu1 }
0x13c9   :  { %v1452_v16 = vpop.f32.mrb[13].mxu1  ;;  %v1457_v20 = vrot.slane %v1450_v19, 6 }
0x13ca   :  { %v1458_v30 = vrot.slane %v1452_v16, 6 }
0x13cb   :  { %v1461_v21 = vadd.f32 %v1457_v20, %v3280_v25 }
0x13cc   :  { %v1462_v57 = vadd.f32 %v1458_v30, %v3269_v26 }
0x13cd   :  { %v2244_v24 = vmul.f32 -1.442695, %v1461_v21 }
0x13ce   :  { %2673 = vtanh.f32 %v1462_v57  ;;  %v2245_v27 = vmul.f32 -1.442695, %v1462_v57 }
0x13cf   :  { %2675 = vpow2.f32 %v2244_v24 }
0x13d8   :  { %v2674_v17 = vpop.eup %2673 }
0x13d9   :  { %1481 = vrot.lane.b32.xlu1 %v2674_v17, %s2883_s21  ;;  %v2676_v0 = vpop.eup %2675 }
0x13da   :  { %v1469_v18 = vadd.f32 1.0, %v2676_v0 }
0x13dc   :  { %2677 = vrcp.f32 %v1469_v18 }
0x13e6   :  { %v2678_v4 = vpop.eup %2677 }
0x13e7   :  { %v1479_v53 = vmul.f32 %v2678_v4, %v1477_v33 }
0x144b   :  { %v1482_v31 = vpop.permute.xlu1 %1481 }
0x144c   :  { %v1484_v32 = vmul.f32 %v2678_v4, %v1482_v31 }
0x144e   :  { %1486 = vrot.lane.b32.xlu0 %v1484_v32, %s2883_s21 }
0x14c0   :  { %v1487_v29 = vpop.permute.xlu0 %1486 }
0x14c1   :  { %v1489_v14 = vadd.f32 %v1487_v29, %v1479_v53 }
0x14c3   :  { %2679 = vtanh.f32 %v1489_v14  ;;  %v1593_v2 = vrot.slane %v1489_v14, 6 }
0x14c4   :  { %2681 = vpow2.f32 %v2245_v27 }
0x14cd   :  { %v2680_v23 = vpop.eup %2679 }
0x14ce   :  { %1492 = vrot.lane.b32.xlu1 %v2680_v23, %s2883_s21  ;;  %v2682_v34 = vpop.eup %2681 }
0x14cf   :  { %v1470_v36 = vadd.f32 1.0, %v2682_v34 }
0x14d1   :  { %2683 = vrcp.f32 %v1470_v36 }
0x14db   :  { %v2684_v9 = vpop.eup %2683 }
0x1540   :  { %v1493_v40 = vpop.permute.xlu1 %1492 }
0x1541   :  { %v1495_v52 = vmul.f32 %v2684_v9, %v1493_v40 }
0x1543   :  { %v1497_v63 = vrot.slane %v1495_v52, 2  ;;  %v3352_v52 = vadd.f32 %v3304_v55, %v3264_v22 }
0x1545   :  { %2246 = vmatmul.mubr.msk.f32.vlgmr.msra.gmra.mrb[14].mxu0 %vm132_vm0, %v1497_v63 }
0x1546   :  { %2493 = vmatpush1.bf16.msra.mxu0 %v3207_v42  ;;  %1796 = vmatprep.mubr.f32.mxu0 %v2882_v1 }
0x1547   :  { %2495 = vmatprep.subr.bf16.mxu0 %v3212_v44 }
0x154a   :  { %2497 = vmatpush1.bf16.msra.mxu0 %v3214_v10 }
0x154b   :  { %2499 = vmatprep.subr.bf16.mxu0 %v3218_v59 }
0x154e   :  { %2501 = vmatpush1.bf16.msra.mxu0 %v3220_v56 }
0x154f   :  { %2503 = vmatprep.subr.bf16.mxu0 %v3225_v61 }
0x1552   :  { %2505 = vmatpush1.bf16.msra.mxu0 %v3227_v6 }
0x1553   :  { %2523 = vmatprep.subr.bf16.mxu0 %v3205_v37 }
0x1618   :  { %v1566_v35 = vpop.f32.mrb[14].mxu0 }
0x1619   :  { %v1568_v49 = vpop.f32.mrb[15].mxu0  ;;  %v1573_v43 = vrot.slane %v1566_v35, 4 }
0x161a   :  { %v1574_v28 = vrot.slane %v1568_v49, 4 }
0x161b   :  { %v1577_v41 = vadd.f32 %v1573_v43, %v3280_v25 }
0x161c   :  { %v1578_v38 = vadd.f32 %v1574_v28, %v3269_v26 }
0x161d   :  { %v2247_v46 = vmul.f32 -1.442695, %v1577_v41 }
0x161e   :  { %2685 = vtanh.f32 %v1578_v38  ;;  %v2248_v5 = vmul.f32 -1.442695, %v1578_v38  ;;  %v3358_v38 = vadd.f32 %v3302_v15, %v3276_v3 }
0x161f   :  { %2687 = vpow2.f32 %v2247_v46 }
0x1628   :  { %v2686_v39 = vpop.eup %2685 }
0x1629   :  { %1597 = vrot.lane.b32.xlu0 %v2686_v39, %s2883_s21  ;;  %v2688_v47 = vpop.eup %2687 }
0x162a   :  { %v1585_v48 = vadd.f32 1.0, %v2688_v47 }
0x162c   :  { %2689 = vrcp.f32 %v1585_v48 }
0x1636   :  { %v2690_v50 = vpop.eup %2689 }
0x1637   :  { %v1595_v58 = vmul.f32 %v2690_v50, %v1593_v2 }
0x169b   :  { %v1598_v51 = vpop.permute.xlu0 %1597 }
0x169c   :  { %v1600_v54 = vmul.f32 %v2690_v50, %v1598_v51 }
0x169e   :  { %1602 = vrot.lane.b32.xlu1 %v1600_v54, %s2883_s21 }
0x1710   :  { %v1603_v45 = vpop.permute.xlu1 %1602 }
0x1711   :  { %v1605_v60 = vadd.f32 %v1603_v45, %v1595_v58 }
0x1713   :  { %2691 = vtanh.f32 %v1605_v60  ;;  %v1709_v33 = vrot.slane %v1605_v60, 6 }
0x1714   :  { %2693 = vpow2.f32 %v2248_v5 }
0x171d   :  { %v2692_v62 = vpop.eup %2691 }
0x171e   :  { %1608 = vrot.lane.b32.xlu0 %v2692_v62, %s2883_s21  ;;  %v2694_v7 = vpop.eup %2693 }
0x171f   :  { %v1586_v8 = vadd.f32 1.0, %v2694_v7 }
0x1721   :  { %2695 = vrcp.f32 %v1586_v8 }
0x172b   :  { %v2696_v11 = vpop.eup %2695 }
0x1790   :  { %v1609_v12 = vpop.permute.xlu0 %1608 }
0x1791   :  { %v1611_v13 = vmul.f32 %v2696_v11, %v1609_v12 }
0x1793   :  { %v1613_v19 = vrot.slane %v1611_v13, 4 }
0x1795   :  { %2249 = vmatmul.mubr.msk.f32.vlgmr.msra.gmra.mrb[14].mxu1 %vm132_vm0, %v1613_v19 }
0x1796   :  { %2509 = vmatpush1.bf16.msra.mxu1 %v3207_v42  ;;  %1905 = vmatprep.mubr.f32.mxu1 %v2882_v1 }
0x1797   :  { %2511 = vmatprep.subr.bf16.mxu1 %v3212_v44 }
0x179a   :  { %2513 = vmatpush1.bf16.msra.mxu1 %v3214_v10 }
0x179b   :  { %2515 = vmatprep.subr.bf16.mxu1 %v3218_v59 }
0x179e   :  { %2517 = vmatpush1.bf16.msra.mxu1 %v3220_v56 }
0x179f   :  { %2519 = vmatprep.subr.bf16.mxu1 %v3225_v61 }
0x17a2   :  { %2521 = vmatpush1.bf16.msra.mxu1 %v3227_v6 }
0x17a3   :  { %2539 = vmatprep.subr.bf16.mxu1 %v3205_v37 }
0x1868   :  { %v1682_v16 = vpop.f32.mrb[14].mxu1 }
0x1869   :  { %v1684_v30 = vpop.f32.mrb[15].mxu1  ;;  %v1689_v21 = vrot.slane %v1682_v16, 2 }
0x186a   :  { %v1690_v57 = vrot.slane %v1684_v30, 2 }
0x186b   :  { %v1693_v24 = vadd.f32 %v1689_v21, %v3280_v25 }
0x186c   :  { %v1694_v17 = vadd.f32 %v1690_v57, %v3269_v26 }
0x186d   :  { %v2250_v0 = vmul.f32 -1.442695, %v1693_v24 }
0x186e   :  { %2697 = vtanh.f32 %v1694_v17  ;;  %v2251_v23 = vmul.f32 -1.442695, %v1694_v17 }
0x186f   :  { %2699 = vpow2.f32 %v2250_v0 }
0x1878   :  { %v2698_v20 = vpop.eup %2697 }
0x1879   :  { %1713 = vrot.lane.b32.xlu1 %v2698_v20, %s2883_s21  ;;  %v2700_v18 = vpop.eup %2699 }
0x187a   :  { %v1701_v4 = vadd.f32 1.0, %v2700_v18 }
0x187c   :  { %2701 = vrcp.f32 %v1701_v4 }
0x1886   :  { %v2702_v31 = vpop.eup %2701 }
0x1887   :  { %v1711_v53 = vmul.f32 %v2702_v31, %v1709_v33 }
0x18eb   :  { %v1714_v32 = vpop.permute.xlu1 %1713 }
0x18ec   :  { %v1716_v37 = vmul.f32 %v2702_v31, %v1714_v32 }
0x18ee   :  { %1718 = vrot.lane.b32.xlu0 %v1716_v37, %s2883_s21 }
0x1960   :  { %v1719_v26 = vpop.permute.xlu0 %1718 }
0x1961   :  { %v1721_v29 = vadd.f32 %v1719_v26, %v1711_v53 }
0x1963   :  { %2703 = vtanh.f32 %v1721_v29  ;;  %v1819_v48 = vrot.slane %v1721_v29, 6 }
0x1964   :  { %2705 = vpow2.f32 %v2251_v23 }
0x196d   :  { %v2704_v14 = vpop.eup %2703 }
0x196e   :  { %1724 = vrot.lane.b32.xlu1 %v2704_v14, %s2883_s21  ;;  %v2706_v25 = vpop.eup %2705 }
0x196f   :  { %v1702_v27 = vadd.f32 1.0, %v2706_v25 }
0x1971   :  { %2707 = vrcp.f32 %v1702_v27 }
0x197b   :  { %v2708_v34 = vpop.eup %2707 }
0x19e0   :  { %v1725_v36 = vpop.permute.xlu1 %1724 }
0x19e1   :  { %v1727_v9 = vmul.f32 %v2708_v34, %v1725_v36 }
0x19e3   :  { %v1729_v40 = vrot.slane %v1727_v9, 6 }
0x19e5   :  { %2252 = vmatmul.mubr.msk.f32.vlgmr.msra.gmra.mrb[16].mxu0 %vm132_vm0, %v1729_v40 }
0x19e6   :  { %2525 = vmatpush1.bf16.msra.mxu0 %v3207_v42  ;;  %2021 = vmatprep.mubr.f32.mxu0 %v2882_v1 }
0x19e7   :  { %2527 = vmatprep.subr.bf16.mxu0 %v3212_v44 }
0x19ea   :  { %2529 = vmatpush1.bf16.msra.mxu0 %v3214_v10 }
0x19eb   :  { %2531 = vmatprep.subr.bf16.mxu0 %v3218_v59 }
0x19ee   :  { %2533 = vmatpush1.bf16.msra.mxu0 %v3220_v56 }
0x19ef   :  { %2535 = vmatprep.subr.bf16.mxu0 %v3225_v61 }
0x19f2   :  { %2537 = vmatpush1.bf16.msra.mxu0 %v3227_v6 }
0x1ab8   :  { %v1798_v63 = vpop.f32.mrb[16].mxu0 }
0x1ab9   :  { %v1800_v35 = vpop.f32.mrb[17].mxu0  ;;  %v1803_v39 = vadd.f32 %v1798_v63, %v3358_v38 }
0x1aba   :  { %v1804_v49 = vadd.f32 %v1800_v35, %v3352_v52 }
0x1abb   :  { %v2253_v43 = vmul.f32 -1.442695, %v1803_v39 }
0x1abc   :  { %2709 = vtanh.f32 %v1804_v49  ;;  %v2254_v3 = vmul.f32 -1.442695, %v1804_v49 }
0x1abd   :  { %2711 = vpow2.f32 %v2253_v43 }
0x1ac6   :  { %v2710_v28 = vpop.eup %2709 }
0x1ac7   :  { %1823 = vrot.lane.b32.xlu0 %v2710_v28, %s2883_s21  ;;  %v2712_v41 = vpop.eup %2711 }
0x1ac8   :  { %v1811_v46 = vadd.f32 1.0, %v2712_v41 }
0x1aca   :  { %2713 = vrcp.f32 %v1811_v46 }
0x1ad4   :  { %v2714_v22 = vpop.eup %2713 }
0x1ad5   :  { %v1821_v50 = vmul.f32 %v2714_v22, %v1819_v48 }
0x1b39   :  { %v1824_v55 = vpop.permute.xlu0 %1823 }
0x1b3a   :  { %v1826_v47 = vmul.f32 %v2714_v22, %v1824_v55 }
0x1b3c   :  { %1828 = vrot.lane.b32.xlu1 %v1826_v47, %s2883_s21 }
0x1bae   :  { %v1829_v51 = vpop.permute.xlu1 %1828 }
0x1baf   :  { %v1831_v54 = vadd.f32 %v1829_v51, %v1821_v50 }
0x1bb1   :  { %2715 = vtanh.f32 %v1831_v54  ;;  %v1934_v13 = vrot.slane %v1831_v54, 6 }
0x1bb2   :  { %2717 = vpow2.f32 %v2254_v3 }
0x1bbb   :  { %v2716_v2 = vpop.eup %2715 }
0x1bbc   :  { %1834 = vrot.lane.b32.xlu0 %v2716_v2, %s2883_s21  ;;  %v2718_v15 = vpop.eup %2717 }
0x1bbd   :  { %v1812_v58 = vadd.f32 1.0, %v2718_v15 }
0x1bbf   :  { %2719 = vrcp.f32 %v1812_v58 }
0x1bc9   :  { %v2720_v45 = vpop.eup %2719 }
0x1c2e   :  { %v1835_v60 = vpop.permute.xlu0 %1834 }
0x1c2f   :  { %v1837_v62 = vmul.f32 %v2720_v45, %v1835_v60 }
0x1c31   :  { %2255 = vmatmul.mubr.msk.f32.vlgmr.msra.gmra.mrb[16].mxu1 %vm132_vm0, %v1837_v62 }
0x1c32   :  { %2541 = vmatpush1.bf16.msra.mxu1 %v3207_v42  ;;  %2137 = vmatprep.mubr.f32.mxu1 %v2882_v1 }
0x1c33   :  { %2543 = vmatprep.subr.bf16.mxu1 %v3212_v44 }
0x1c36   :  { %2545 = vmatpush1.bf16.msra.mxu1 %v3214_v10 }
0x1c37   :  { %2547 = vmatprep.subr.bf16.mxu1 %v3218_v59 }
0x1c3a   :  { %2549 = vmatpush1.bf16.msra.mxu1 %v3220_v56 }
0x1c3b   :  { %2551 = vmatprep.subr.bf16.mxu1 %v3225_v61 }
0x1c3e   :  { %2553 = vmatpush1.bf16.msra.mxu1 %v3227_v6 }
0x1d04   :  { %v1907_v5 = vpop.f32.mrb[16].mxu1 }
0x1d05   :  { %v1909_v7 = vpop.f32.mrb[17].mxu1  ;;  %v1914_v1 = vrot.slane %v1907_v5, 6 }
0x1d06   :  { %v1915_v8 = vrot.slane %v1909_v7, 6 }
0x1d07   :  { %v1918_v44 = vadd.f32 %v1914_v1, %v3358_v38 }
0x1d08   :  { %v1919_v11 = vadd.f32 %v1915_v8, %v3352_v52 }
0x1d09   :  { %v2256_v10 = vmul.f32 -1.442695, %v1918_v44 }
0x1d0a   :  { %2721 = vtanh.f32 %v1919_v11  ;;  %v2257_v17 = vmul.f32 -1.442695, %v1919_v11 }
0x1d0b   :  { %2723 = vpow2.f32 %v2256_v10 }
0x1d14   :  { %v2722_v42 = vpop.eup %2721 }
0x1d15   :  { %1938 = vrot.lane.b32.xlu1 %v2722_v42, %s2883_s21  ;;  %v2724_v59 = vpop.eup %2723 }
0x1d16   :  { %v1926_v56 = vadd.f32 1.0, %v2724_v59 }
0x1d18   :  { %2725 = vrcp.f32 %v1926_v56  ;;  %v2264_v56 = vld [vmem:[%s3402_s7] ss:$0 sm:$0xff] }
0x1d22   :  { %v2726_v61 = vpop.eup %2725 }
0x1d23   :  { %v1936_v19 = vmul.f32 %v2726_v61, %v1934_v13  ;;  %v2265_v13 = vld [vmem:[#allocation2] ss:$0 sm:$0xff] }
0x1d87   :  { %v1939_v12 = vpop.permute.xlu1 %1938 }
0x1d88   :  { %v1941_v6 = vmul.f32 %v2726_v61, %v1939_v12 }
0x1d8a   :  { %1943 = vrot.lane.b32.xlu0 %v1941_v6, %s2883_s21 }
0x1dfc   :  { %v1944_v16 = vpop.permute.xlu0 %1943 }
0x1dfd   :  { %v1946_v30 = vadd.f32 %v1944_v16, %v1936_v19 }
0x1dff   :  { %2727 = vtanh.f32 %v1946_v30  ;;  %v2050_v9 = vrot.slane %v1946_v30, 6 }
0x1e00   :  { %2729 = vpow2.f32 %v2257_v17 }
0x1e09   :  { %v2728_v57 = vpop.eup %2727 }
0x1e0a   :  { %1949 = vrot.lane.b32.xlu1 %v2728_v57, %s2883_s21  ;;  %v2730_v20 = vpop.eup %2729 }
0x1e0b   :  { %v1927_v21 = vadd.f32 1.0, %v2730_v20 }
0x1e0d   :  { %2731 = vrcp.f32 %v1927_v21 }
0x1e17   :  { %v2732_v24 = vpop.eup %2731 }
0x1e7c   :  { %v1950_v0 = vpop.permute.xlu1 %1949 }
0x1e7d   :  { %v1952_v18 = vmul.f32 %v2732_v24, %v1950_v0 }
0x1e7f   :  { %v1954_v4 = vrot.slane %v1952_v18, 2 }
0x1e81   :  { %2258 = vmatmul.mubr.msk.f32.vlgmr.msra.gmra.mrb[18].mxu0 %vm132_vm0, %v1954_v4 }
0x1f54   :  { %v2023_v31 = vpop.f32.mrb[18].mxu0 }
0x1f55   :  { %v2025_v32 = vpop.f32.mrb[19].mxu0  ;;  %v2030_v26 = vrot.slane %v2023_v31, 4 }
0x1f56   :  { %v2031_v37 = vrot.slane %v2025_v32, 4 }
0x1f57   :  { %v2034_v29 = vadd.f32 %v2030_v26, %v3358_v38 }
0x1f58   :  { %v2035_v33 = vadd.f32 %v2031_v37, %v3352_v52 }
0x1f59   :  { %v2259_v14 = vmul.f32 -1.442695, %v2034_v29 }
0x1f5a   :  { %2733 = vtanh.f32 %v2035_v33  ;;  %v2260_v28 = vmul.f32 -1.442695, %v2035_v33 }
0x1f5b   :  { %2735 = vpow2.f32 %v2259_v14 }
0x1f64   :  { %v2734_v53 = vpop.eup %2733 }
0x1f65   :  { %2054 = vrot.lane.b32.xlu0 %v2734_v53, %s2883_s21  ;;  %v2736_v23 = vpop.eup %2735 }
0x1f66   :  { %v2042_v25 = vadd.f32 1.0, %v2736_v23 }
0x1f68   :  { %2737 = vrcp.f32 %v2042_v25 }
0x1f72   :  { %v2738_v27 = vpop.eup %2737 }
0x1f73   :  { %v2052_v40 = vmul.f32 %v2738_v27, %v2050_v9 }
0x1fd7   :  { %v2055_v34 = vpop.permute.xlu0 %2054 }
0x1fd8   :  { %v2057_v36 = vmul.f32 %v2738_v27, %v2055_v34 }
0x1fda   :  { %2059 = vrot.lane.b32.xlu1 %v2057_v36, %s2883_s21 }
0x204c   :  { %v2060_v63 = vpop.permute.xlu1 %2059 }
0x204d   :  { %v2062_v35 = vadd.f32 %v2060_v63, %v2052_v40 }
0x204f   :  { %2739 = vtanh.f32 %v2062_v35  ;;  %v2166_v7 = vrot.slane %v2062_v35, 6 }
0x2050   :  { %2741 = vpow2.f32 %v2260_v28 }
0x2059   :  { %v2740_v49 = vpop.eup %2739 }
0x205a   :  { %2065 = vrot.lane.b32.xlu0 %v2740_v49, %s2883_s21  ;;  %v2742_v39 = vpop.eup %2741 }
0x205b   :  { %v2043_v43 = vadd.f32 1.0, %v2742_v39 }
0x205d   :  { %2743 = vrcp.f32 %v2043_v43 }
0x2067   :  { %v2744_v41 = vpop.eup %2743 }
0x20cc   :  { %v2066_v46 = vpop.permute.xlu0 %2065 }
0x20cd   :  { %v2068_v22 = vmul.f32 %v2744_v41, %v2066_v46 }
0x20cf   :  { %v2070_v55 = vrot.slane %v2068_v22, 4 }
0x20d1   :  { %2261 = vmatmul.mubr.msk.f32.vlgmr.msra.gmra.mrb[18].mxu1 %vm132_vm0, %v2070_v55 }
0x21a4   :  { %v2139_v47 = vpop.f32.mrb[18].mxu1 }
0x21a5   :  { %v2141_v48 = vpop.f32.mrb[19].mxu1  ;;  %v2146_v2 = vrot.slane %v2139_v47, 2 }
0x21a6   :  { %v2147_v50 = vrot.slane %v2141_v48, 2 }
0x21a7   :  { %v2150_v3 = vadd.f32 %v2146_v2, %v3358_v38 }
0x21a8   :  { %v2151_v51 = vadd.f32 %v2147_v50, %v3352_v52 }
0x21a9   :  { %v2262_v15 = vmul.f32 -1.442695, %v2150_v3 }
0x21aa   :  { %2745 = vtanh.f32 %v2151_v51  ;;  %v2263_v1 = vmul.f32 -1.442695, %v2151_v51 }
0x21ab   :  { %2747 = vpow2.f32 %v2262_v15 }
0x21b4   :  { %v2746_v54 = vpop.eup %2745 }
0x21b5   :  { %2170 = vrot.lane.b32.xlu1 %v2746_v54, %s2883_s21  ;;  %v2748_v58 = vpop.eup %2747 }
0x21b6   :  { %v2158_v45 = vadd.f32 1.0, %v2748_v58 }
0x21b8   :  { %2749 = vrcp.f32 %v2158_v45 }
0x21c2   :  { %v2750_v60 = vpop.eup %2749 }
0x21c3   :  { %v2168_v8 = vmul.f32 %v2750_v60, %v2166_v7 }
0x2227   :  { %v2171_v62 = vpop.permute.xlu1 %2170 }
0x2228   :  { %v2173_v5 = vmul.f32 %v2750_v60, %v2171_v62 }
0x222a   :  { %2175 = vrot.lane.b32.xlu0 %v2173_v5, %s2883_s21 }
0x229c   :  { %v2176_v52 = vpop.permute.xlu0 %2175 }
0x229d   :  { %v2178_v11 = vadd.f32 %v2176_v52, %v2168_v8 }
0x229f   :  { %2751 = vtanh.f32 %v2178_v11 }
0x22a0   :  { %2753 = vpow2.f32 %v2263_v1 }
0x22a9   :  { %v2752_v42 = vpop.eup %2751 }
0x22aa   :  { %2181 = vrot.lane.b32.xlu1 %v2752_v42, %s2883_s21  ;;  %v2754_v38 = vpop.eup %2753 }
0x22ab   :  { %v2159_v44 = vadd.f32 1.0, %v2754_v38 }
0x22ad   :  { %2755 = vrcp.f32 %v2159_v44 }
0x22b7   :  { %v2756_v10 = vpop.eup %2755 }
0x231c   :  { %v2182_v59 = vpop.permute.xlu1 %2181 }
0x231d   :  { %v2184_v61 = vmul.f32 %v2756_v10, %v2182_v59 }
0x231f   :  { %v2192_v12 = vmul.f32 %v2264_v56, %v2184_v61 }
0x2321   :  { %v2194_v6 = vsel %vm2193_vm4, %v2192_v12, 0.0 }
0x2322   :  { %2195 = vadd.xlane.f32.xlu0 %v2194_v6 }
0x23af   :  { %v2196_v19 = vpop.xlane.xlu0 %2195 }
0x23b0   :  { %v2204_v16 = vadd.f32 %v2265_v13, %v2196_v19 }
0x23b2   :  { %2206 = vst.msk [vmem:[%s3404_s9 - $0x6] sm:$0xc0] %vm2205_vm5, %v2204_v16 }
0x23b3   :  { %2211 = vsyncpa [#allocation4], 1 }
0x23b4   :  { %2212 = vsyncpa [#allocation6], 1 }
0x23b5   :  { %2213 = vsyncpa [#allocation9], 1 }

</bundles_post_ra>
